<compile_context>
chip_gen: v7x
topology: tpu7x:2x2x1
jax: 0.10.0
libtpu: 0.0.40
codegen_flags: <defaults>
</compile_context>

<pallas_src>
import functools

import jax
import jax.numpy as jnp
from jax.experimental import pallas as pl
from jax.experimental.pallas import tpu as pltpu


# ----------------------------- Pallas kernel ------------------------------ #

def length_model_kernel(embeds_ref, xlen_ref,
                        wih1_ref, whh1_ref, b1_ref,
                        wih2_ref, whh2_ref, b2_ref,
                        wout_ref, bout_ref,
                        out_ref,
                        *, H, T):
    # embeds_ref: (T*Bp, E) bf16 (time-major, batch-padded, pre-flattened in the wrapper)
    # xlen_ref:   (Bp, 1) i32
    # wih1_ref: (E, 4H) bf16   whh1_ref: (H, 4H) bf16   b1_ref: (1, 4H) f32
    # wih2_ref: (H, 4H) bf16   whh2_ref: (H, 4H) bf16   b2_ref: (1, 4H) f32
    # wout_ref: (1, H) f32     bout_ref: (1, 1) f32     out_ref: (Bp, 1) f32
    Bp = xlen_ref.shape[0]

    # ---------------- loop-invariant hoists ----------------
    whh1 = whh1_ref[...]                       # (H, 4H) bf16
    wih2 = wih2_ref[...]                       # (H, 4H) bf16
    whh2 = whh2_ref[...]                       # (H, 4H) bf16
    b2 = b2_ref[...]                           # (1, 4H) f32
    xlen_m1 = xlen_ref[...] - 1                # (Bp, 1) i32

    # ---------------- hoisted layer-1 input projection ----------------
    # One well-shaped bf16 MXU matmul for all time steps (bias b1 = b_ih1 + b_hh1 folded in).
    xg1 = (jnp.dot(embeds_ref[...], wih1_ref[...],
                   preferred_element_type=jnp.float32)
           + b1_ref[...])                      # (T*Bp, 4H) f32, ~T vregs at these sizes

    def gates_to_hc(gates, c):
        # Kernel gate-column order is [i, f, o, g]:
        #   one sigmoid over the first 3H lanes, one tanh over the last H lanes.
        sig = jax.nn.sigmoid(gates[:, :3 * H])
        g = jnp.tanh(gates[:, 3 * H:])
        i = sig[:, 0 * H:1 * H]
        f = sig[:, 1 * H:2 * H]
        o = sig[:, 2 * H:3 * H]
        c_new = f * c + i * g
        return o * jnp.tanh(c_new), c_new

    # ---------------- state init (SSA carries across the static unroll) ----------------
    zeros = jnp.zeros((Bp, H), jnp.float32)
    c1 = zeros
    c2 = zeros
    h2 = zeros
    last = zeros
    h1b = jnp.zeros((Bp, H), jnp.bfloat16)     # bf16 copies fed to the MXU
    h2b = jnp.zeros((Bp, H), jnp.bfloat16)

    # ---------------- recurrence: static unroll, no per-step gating ----------------
    # Running trailing pad steps is correct: `last` is where-gated on x_len-1 and pad
    # embeddings are zero, so no pl.when / t_max is needed.
    for t in range(T):
        # Both recurrent matmuls issued first: they depend only on the previous step's
        # state, so they overlap this step's VPU/EUP gate math.
        rec1 = jnp.dot(h1b, whh1, preferred_element_type=jnp.float32)   # (Bp, 4H)
        rec2 = jnp.dot(h2b, whh2, preferred_element_type=jnp.float32)   # (Bp, 4H)

        # layer 1
        gates1 = xg1[t * Bp:(t + 1) * Bp, :] + rec1      # static, sublane-aligned slice
        h1, c1 = gates_to_hc(gates1, c1)
        h1b = h1.astype(jnp.bfloat16)

        # layer 2 (input projection of h1 is the only MXU op on the in-step critical path)
        gates2 = jnp.dot(h1b, wih2, preferred_element_type=jnp.float32) + rec2 + b2
        h2, c2 = gates_to_hc(gates2, c2)
        h2b = h2.astype(jnp.bfloat16)

        # gather-equivalent: capture the top-layer hidden at the last valid step
        last = jnp.where(xlen_m1 == t, h2, last)

    # ---------------- output head: VPU multiply + lane reduce ----------------
    out_ref[...] = (jnp.sum(last * wout_ref[...], axis=1, keepdims=True)
                    + bout_ref[...])


# ------------------------------ JAX wrapper -------------------------------- #

def length_model_forward(x_seqs, x_len, kparams):
    """x_seqs: (B, T) int32 token ids, x_len: (B,) valid lengths. Returns (B,) f32."""
    # TODO(synk): embedding gather stays in plain JAX; fuse via PrefetchScalarGridSpec +
    # pl.Element row-gather only if T*B*E grows enough to matter.
    embeds = kparams["emb"][x_seqs]                          # (B, T, E) f32
    B, T, E = embeds.shape
    H = kparams["whh1_t"].shape[0]

    # Pad batch to the f32 sublane count (8); per-step slices stay vreg-aligned.
    Bp = max(8, ((B + 7) // 8) * 8)
    embeds_tm = jnp.transpose(embeds, (1, 0, 2))             # (T, B, E) time-major
    if Bp != B:
        embeds_tm = jnp.pad(embeds_tm, ((0, 0), (0, Bp - B), (0, 0)))
        xlen_p = jnp.concatenate(
            [x_len.astype(jnp.int32), jnp.ones((Bp - B,), jnp.int32)])
    else:
        xlen_p = x_len.astype(jnp.int32)

    # Flatten in the wrapper (XLA/HBM side) so the kernel never reshapes in VMEM;
    # cast the only per-token input to bf16 (MXU operand).
    embeds_flat = embeds_tm.reshape(T * Bp, E).astype(jnp.bfloat16)
    xlen2d = xlen_p.reshape(Bp, 1)

    vmem = pl.BlockSpec(memory_space=pltpu.MemorySpace.VMEM)

    out = pl.pallas_call(
        functools.partial(length_model_kernel, H=H, T=T),
        out_shape=jax.ShapeDtypeStruct((Bp, 1), jnp.float32),
        in_specs=[vmem, vmem,                   # embeds_flat, xlen
                  vmem, vmem, vmem,             # wih1_t, whh1_t, b1
                  vmem, vmem, vmem,             # wih2_t, whh2_t, b2
                  vmem, vmem],                  # wout, bout
        out_specs=vmem,
    )(embeds_flat, xlen2d,
      kparams["wih1_t"], kparams["whh1_t"], kparams["b1"],
      kparams["wih2_t"], kparams["whh2_t"], kparams["b2"],
      kparams["wout"], kparams["bout"])

    return out[:B, 0]                                        # drop batch padding, .squeeze(1)


# --------------------------- parameter creation ----------------------------- #

def init_params(key, vocab_size, emb_dim, hid_dim, pad_idx=0):
    """PyTorch-layout parameters (gate row order [i, f, g, o])."""
    ks = jax.random.split(key, 11)
    emb = 0.1 * jax.random.normal(ks[0], (vocab_size, emb_dim), jnp.float32)
    emb = emb.at[pad_idx].set(0.0)                           # nn.Embedding padding_idx

    bound = 1.0 / float(hid_dim) ** 0.5

    def u(k, shape):
        return jax.random.uniform(k, shape, jnp.float32, -bound, bound)

    return dict(
        emb=emb,
        wih_l0=u(ks[1], (4 * hid_dim, emb_dim)),
        whh_l0=u(ks[2], (4 * hid_dim, hid_dim)),
        bih_l0=u(ks[3], (4 * hid_dim,)), bhh_l0=u(ks[4], (4 * hid_dim,)),
        wih_l1=u(ks[5], (4 * hid_dim, hid_dim)),
        whh_l1=u(ks[6], (4 * hid_dim, hid_dim)),
        bih_l1=u(ks[7], (4 * hid_dim,)), bhh_l1=u(ks[8], (4 * hid_dim,)),
        wout=u(ks[9], (1, hid_dim)),                         # num_dirs = 1 -> in = hid_dim
        bout=u(ks[10], (1,)),
    )


def prepare_kernel_params(p):
    """Kernel-layout weights: transposed, gate columns permuted to [i, f, o, g],
    fused biases, MXU operands in bf16."""
    H = p["whh_l0"].shape[1]
    perm = jnp.concatenate([jnp.arange(0, 2 * H),            # i, f
                            jnp.arange(3 * H, 4 * H),        # o
                            jnp.arange(2 * H, 3 * H)])       # g
    bf16 = jnp.bfloat16
    return dict(
        emb=p["emb"],
        wih1_t=p["wih_l0"][perm].T.astype(bf16),             # (E, 4H)
        whh1_t=p["whh_l0"][perm].T.astype(bf16),             # (H, 4H)
        b1=(p["bih_l0"] + p["bhh_l0"])[perm].reshape(1, -1),
        wih2_t=p["wih_l1"][perm].T.astype(bf16),             # (H, 4H)
        whh2_t=p["whh_l1"][perm].T.astype(bf16),             # (H, 4H)
        b2=(p["bih_l1"] + p["bhh_l1"])[perm].reshape(1, -1),
        wout=p["wout"],                                      # (1, H) f32 (VPU head)
        bout=p["bout"].reshape(1, 1),                        # (1, 1) f32
    )


# ---------------------------- pure-JAX reference ---------------------------- #

def reference_forward(x_seqs, x_len, params):
    """Exact PyTorch-semantics forward (f32, HIGHEST precision, gate order [i,f,g,o])."""
    embeds = params["emb"][x_seqs]                           # (B, T, E)
    B, T, _ = embeds.shape
    H = params["whh_l0"].shape[1]
    hp = jax.lax.Precision.HIGHEST

    def cell(x, h, c, wih, whh, bih, bhh):
        gates = (jnp.dot(x, wih.T, precision=hp) + bih
                 + jnp.dot(h, whh.T, precision=hp) + bhh)
        i = jax.nn.sigmoid(gates[:, 0 * H:1 * H])
        f = jax.nn.sigmoid(gates[:, 1 * H:2 * H])
        g = jnp.tanh(gates[:, 2 * H:3 * H])
        o = jax.nn.sigmoid(gates[:, 3 * H:4 * H])
        c = f * c + i * g
        return o * jnp.tanh(c), c

    h1 = c1 = h2 = c2 = jnp.zeros((B, H), jnp.float32)
    last = jnp.zeros((B, H), jnp.float32)
    xlen = x_len.astype(jnp.int32).reshape(B, 1)
    for t in range(T):
        h1, c1 = cell(embeds[:, t, :], h1, c1,
                      params["wih_l0"], params["whh_l0"], params["bih_l0"], params["bhh_l0"])
        h2, c2 = cell(h1, h2, c2,
                      params["wih_l1"], params["whh_l1"], params["bih_l1"], params["bhh_l1"])
        last = jnp.where((xlen - 1) == t, h2, last)
    return jnp.sum(last * params["wout"], axis=1) + params["bout"][0]


# --------------------------------- main ------------------------------------ #

if __name__ == "__main__":
    VOCAB, EMB, HID = 50, 32, 32
    B, T = 2, 8
    PAD_IDX = 0

    key = jax.random.PRNGKey(0)
    k_param, k_seq = jax.random.split(key)

    params = init_params(k_param, VOCAB, EMB, HID, pad_idx=PAD_IDX)
    kparams = prepare_kernel_params(params)

    x_len = jnp.array([T, 5], dtype=jnp.int32)               # valid lengths per batch element
    x_seqs = jax.random.randint(k_seq, (B, T), 1, VOCAB, dtype=jnp.int32)
    # zero out (pad) positions beyond each sequence's length
    pos = jnp.arange(T)[None, :]
    x_seqs = jnp.where(pos < x_len[:, None], x_seqs, PAD_IDX)

    out = length_model_forward(x_seqs, x_len, kparams)
    out = jax.block_until_ready(out)

    ref = jax.block_until_ready(reference_forward(x_seqs, x_len, params))
    assert out.shape == (B,), out.shape
    assert jnp.allclose(out, ref, atol=5e-2, rtol=5e-2), (out, ref)

    print("KERNEL_OK")
</pallas_src>

<mosaic_0001>
module attributes {stable_mosaic.version = 11 : i64} {
  func.func @length_model_kernel(%arg0: memref<64x32xbf16, #tpu.memory_space<vmem>>, %arg1: memref<8x1xi32, #tpu.memory_space<vmem>>, %arg2: memref<32x128xbf16, #tpu.memory_space<vmem>>, %arg3: memref<32x128xbf16, #tpu.memory_space<vmem>>, %arg4: memref<1x128xf32, #tpu.memory_space<vmem>>, %arg5: memref<32x128xbf16, #tpu.memory_space<vmem>>, %arg6: memref<32x128xbf16, #tpu.memory_space<vmem>>, %arg7: memref<1x128xf32, #tpu.memory_space<vmem>>, %arg8: memref<1x32xf32, #tpu.memory_space<vmem>>, %arg9: memref<1x1xf32, #tpu.memory_space<vmem>>, %arg10: memref<8x1xf32, #tpu.memory_space<vmem>>) attributes {dimension_semantics = [], scalar_prefetch = 0 : i64, scratch_operands = 0 : i64, tpu.core_type = #tpu.core_type<tc>} {
    %c0 = arith.constant 0 : index
    %c0_0 = arith.constant 0 : index
    %0 = vector.load %arg3[%c0, %c0_0] : memref<32x128xbf16, #tpu.memory_space<vmem>>, vector<32x128xbf16>
    %c0_1 = arith.constant 0 : index
    %c0_2 = arith.constant 0 : index
    %1 = vector.load %arg5[%c0_1, %c0_2] : memref<32x128xbf16, #tpu.memory_space<vmem>>, vector<32x128xbf16>
    %c0_3 = arith.constant 0 : index
    %c0_4 = arith.constant 0 : index
    %2 = vector.load %arg6[%c0_3, %c0_4] : memref<32x128xbf16, #tpu.memory_space<vmem>>, vector<32x128xbf16>
    %c0_5 = arith.constant 0 : index
    %c0_6 = arith.constant 0 : index
    %3 = vector.load %arg7[%c0_5, %c0_6] : memref<1x128xf32, #tpu.memory_space<vmem>>, vector<1x128xf32>
    %c0_7 = arith.constant 0 : index
    %c0_8 = arith.constant 0 : index
    %4 = vector.load %arg1[%c0_7, %c0_8] : memref<8x1xi32, #tpu.memory_space<vmem>>, vector<8x1xi32>
    %c1_i32 = arith.constant 1 : i32
    %5 = vector.broadcast %c1_i32 : i32 to vector<8x1xi32>
    %6 = arith.subi %4, %5 : vector<8x1xi32>
    %c0_9 = arith.constant 0 : index
    %c0_10 = arith.constant 0 : index
    %7 = vector.load %arg0[%c0_9, %c0_10] : memref<64x32xbf16, #tpu.memory_space<vmem>>, vector<64x32xbf16>
    %c0_11 = arith.constant 0 : index
    %c0_12 = arith.constant 0 : index
    %8 = vector.load %arg2[%c0_11, %c0_12] : memref<32x128xbf16, #tpu.memory_space<vmem>>, vector<32x128xbf16>
    %cst = arith.constant dense<0.000000e+00> : vector<64x128xf32>
    %9 = tpu.matmul %7, %8, %cst {dimension_numbers = #tpu.dot_dimension_numbers<[1], [0], [0], [1], [0, 0, 1, 1], [], []>} : vector<64x32xbf16>, vector<32x128xbf16>, vector<64x128xf32> -> vector<64x128xf32>
    %c0_13 = arith.constant 0 : index
    %c0_14 = arith.constant 0 : index
    %10 = vector.load %arg4[%c0_13, %c0_14] : memref<1x128xf32, #tpu.memory_space<vmem>>, vector<1x128xf32>
    %11 = vector.broadcast %10 : vector<1x128xf32> to vector<64x128xf32>
    %12 = arith.addf %9, %11 : vector<64x128xf32>
    %cst_15 = arith.constant 0.000000e+00 : f32
    %13 = vector.broadcast %cst_15 : f32 to vector<8x32xf32>
    %cst_16 = arith.constant 0.000000e+00 : bf16
    %14 = vector.broadcast %cst_16 : bf16 to vector<8x32xbf16>
    %cst_17 = arith.constant 0.000000e+00 : bf16
    %15 = vector.broadcast %cst_17 : bf16 to vector<8x32xbf16>
    %cst_18 = arith.constant dense<0.000000e+00> : vector<8x128xf32>
    %16 = tpu.matmul %14, %0, %cst_18 {dimension_numbers = #tpu.dot_dimension_numbers<[1], [0], [0], [1], [0, 0, 1, 1], [], []>} : vector<8x32xbf16>, vector<32x128xbf16>, vector<8x128xf32> -> vector<8x128xf32>
    %cst_19 = arith.constant dense<0.000000e+00> : vector<8x128xf32>
    %17 = tpu.matmul %15, %2, %cst_19 {dimension_numbers = #tpu.dot_dimension_numbers<[1], [0], [0], [1], [0, 0, 1, 1], [], []>} : vector<8x32xbf16>, vector<32x128xbf16>, vector<8x128xf32> -> vector<8x128xf32>
    %18 = vector.extract_strided_slice %12 {offsets = [0, 0], sizes = [8, 128], strides = [1, 1]} : vector<64x128xf32> to vector<8x128xf32>
    %19 = arith.addf %18, %16 : vector<8x128xf32>
    %20 = vector.extract_strided_slice %19 {offsets = [0, 0], sizes = [8, 96], strides = [1, 1]} : vector<8x128xf32> to vector<8x96xf32>
    %21 = arith.negf %20 : vector<8x96xf32>
    %22 = math.exp %21 : vector<8x96xf32>
    %cst_20 = arith.constant 1.000000e+00 : f32
    %23 = vector.broadcast %cst_20 : f32 to vector<8x96xf32>
    %24 = arith.addf %23, %22 : vector<8x96xf32>
    %25 = arith.divf %23, %24 : vector<8x96xf32>
    %26 = vector.extract_strided_slice %19 {offsets = [0, 96], sizes = [8, 32], strides = [1, 1]} : vector<8x128xf32> to vector<8x32xf32>
    %27 = math.tanh %26 : vector<8x32xf32>
    %28 = vector.extract_strided_slice %25 {offsets = [0, 0], sizes = [8, 32], strides = [1, 1]} : vector<8x96xf32> to vector<8x32xf32>
    %29 = vector.extract_strided_slice %25 {offsets = [0, 32], sizes = [8, 32], strides = [1, 1]} : vector<8x96xf32> to vector<8x32xf32>
    %30 = vector.extract_strided_slice %25 {offsets = [0, 64], sizes = [8, 32], strides = [1, 1]} : vector<8x96xf32> to vector<8x32xf32>
    %31 = arith.mulf %29, %13 : vector<8x32xf32>
    %32 = arith.mulf %28, %27 : vector<8x32xf32>
    %33 = arith.addf %31, %32 : vector<8x32xf32>
    %34 = math.tanh %33 : vector<8x32xf32>
    %35 = arith.mulf %30, %34 : vector<8x32xf32>
    %36 = arith.truncf %35 : vector<8x32xf32> to vector<8x32xbf16>
    %cst_21 = arith.constant dense<0.000000e+00> : vector<8x128xf32>
    %37 = tpu.matmul %36, %1, %cst_21 {dimension_numbers = #tpu.dot_dimension_numbers<[1], [0], [0], [1], [0, 0, 1, 1], [], []>} : vector<8x32xbf16>, vector<32x128xbf16>, vector<8x128xf32> -> vector<8x128xf32>
    %38 = arith.addf %37, %17 : vector<8x128xf32>
    %39 = vector.broadcast %3 : vector<1x128xf32> to vector<8x128xf32>
    %40 = arith.addf %38, %39 : vector<8x128xf32>
    %41 = vector.extract_strided_slice %40 {offsets = [0, 0], sizes = [8, 96], strides = [1, 1]} : vector<8x128xf32> to vector<8x96xf32>
    %42 = arith.negf %41 : vector<8x96xf32>
    %43 = math.exp %42 : vector<8x96xf32>
    %cst_22 = arith.constant 1.000000e+00 : f32
    %44 = vector.broadcast %cst_22 : f32 to vector<8x96xf32>
    %45 = arith.addf %44, %43 : vector<8x96xf32>
    %46 = arith.divf %44, %45 : vector<8x96xf32>
    %47 = vector.extract_strided_slice %40 {offsets = [0, 96], sizes = [8, 32], strides = [1, 1]} : vector<8x128xf32> to vector<8x32xf32>
    %48 = math.tanh %47 : vector<8x32xf32>
    %49 = vector.extract_strided_slice %46 {offsets = [0, 0], sizes = [8, 32], strides = [1, 1]} : vector<8x96xf32> to vector<8x32xf32>
    %50 = vector.extract_strided_slice %46 {offsets = [0, 32], sizes = [8, 32], strides = [1, 1]} : vector<8x96xf32> to vector<8x32xf32>
    %51 = vector.extract_strided_slice %46 {offsets = [0, 64], sizes = [8, 32], strides = [1, 1]} : vector<8x96xf32> to vector<8x32xf32>
    %52 = arith.mulf %50, %13 : vector<8x32xf32>
    %53 = arith.mulf %49, %48 : vector<8x32xf32>
    %54 = arith.addf %52, %53 : vector<8x32xf32>
    %55 = math.tanh %54 : vector<8x32xf32>
    %56 = arith.mulf %51, %55 : vector<8x32xf32>
    %57 = arith.truncf %56 : vector<8x32xf32> to vector<8x32xbf16>
    %c0_i32 = arith.constant 0 : i32
    %58 = vector.broadcast %c0_i32 : i32 to vector<8x1xi32>
    %59 = arith.cmpi eq, %6, %58 : vector<8x1xi32>
    %60 = vector.shape_cast %59 : vector<8x1xi1> to vector<8x1xi1>
    %61 = vector.broadcast %60 : vector<8x1xi1> to vector<8x32xi1>
    %62 = arith.select %61, %56, %13 : vector<8x32xi1>, vector<8x32xf32>
    %cst_23 = arith.constant dense<0.000000e+00> : vector<8x128xf32>
    %63 = tpu.matmul %36, %0, %cst_23 {dimension_numbers = #tpu.dot_dimension_numbers<[1], [0], [0], [1], [0, 0, 1, 1], [], []>} : vector<8x32xbf16>, vector<32x128xbf16>, vector<8x128xf32> -> vector<8x128xf32>
    %cst_24 = arith.constant dense<0.000000e+00> : vector<8x128xf32>
    %64 = tpu.matmul %57, %2, %cst_24 {dimension_numbers = #tpu.dot_dimension_numbers<[1], [0], [0], [1], [0, 0, 1, 1], [], []>} : vector<8x32xbf16>, vector<32x128xbf16>, vector<8x128xf32> -> vector<8x128xf32>
    %65 = vector.extract_strided_slice %12 {offsets = [8, 0], sizes = [8, 128], strides = [1, 1]} : vector<64x128xf32> to vector<8x128xf32>
    %66 = arith.addf %65, %63 : vector<8x128xf32>
    %67 = vector.extract_strided_slice %66 {offsets = [0, 0], sizes = [8, 96], strides = [1, 1]} : vector<8x128xf32> to vector<8x96xf32>
    %68 = arith.negf %67 : vector<8x96xf32>
    %69 = math.exp %68 : vector<8x96xf32>
    %cst_25 = arith.constant 1.000000e+00 : f32
    %70 = vector.broadcast %cst_25 : f32 to vector<8x96xf32>
    %71 = arith.addf %70, %69 : vector<8x96xf32>
    %72 = arith.divf %70, %71 : vector<8x96xf32>
    %73 = vector.extract_strided_slice %66 {offsets = [0, 96], sizes = [8, 32], strides = [1, 1]} : vector<8x128xf32> to vector<8x32xf32>
    %74 = math.tanh %73 : vector<8x32xf32>
    %75 = vector.extract_strided_slice %72 {offsets = [0, 0], sizes = [8, 32], strides = [1, 1]} : vector<8x96xf32> to vector<8x32xf32>
    %76 = vector.extract_strided_slice %72 {offsets = [0, 32], sizes = [8, 32], strides = [1, 1]} : vector<8x96xf32> to vector<8x32xf32>
    %77 = vector.extract_strided_slice %72 {offsets = [0, 64], sizes = [8, 32], strides = [1, 1]} : vector<8x96xf32> to vector<8x32xf32>
    %78 = arith.mulf %76, %33 : vector<8x32xf32>
    %79 = arith.mulf %75, %74 : vector<8x32xf32>
    %80 = arith.addf %78, %79 : vector<8x32xf32>
    %81 = math.tanh %80 : vector<8x32xf32>
    %82 = arith.mulf %77, %81 : vector<8x32xf32>
    %83 = arith.truncf %82 : vector<8x32xf32> to vector<8x32xbf16>
    %cst_26 = arith.constant dense<0.000000e+00> : vector<8x128xf32>
    %84 = tpu.matmul %83, %1, %cst_26 {dimension_numbers = #tpu.dot_dimension_numbers<[1], [0], [0], [1], [0, 0, 1, 1], [], []>} : vector<8x32xbf16>, vector<32x128xbf16>, vector<8x128xf32> -> vector<8x128xf32>
    %85 = arith.addf %84, %64 : vector<8x128xf32>
    %86 = vector.broadcast %3 : vector<1x128xf32> to vector<8x128xf32>
    %87 = arith.addf %85, %86 : vector<8x128xf32>
    %88 = vector.extract_strided_slice %87 {offsets = [0, 0], sizes = [8, 96], strides = [1, 1]} : vector<8x128xf32> to vector<8x96xf32>
    %89 = arith.negf %88 : vector<8x96xf32>
    %90 = math.exp %89 : vector<8x96xf32>
    %cst_27 = arith.constant 1.000000e+00 : f32
    %91 = vector.broadcast %cst_27 : f32 to vector<8x96xf32>
    %92 = arith.addf %91, %90 : vector<8x96xf32>
    %93 = arith.divf %91, %92 : vector<8x96xf32>
    %94 = vector.extract_strided_slice %87 {offsets = [0, 96], sizes = [8, 32], strides = [1, 1]} : vector<8x128xf32> to vector<8x32xf32>
    %95 = math.tanh %94 : vector<8x32xf32>
    %96 = vector.extract_strided_slice %93 {offsets = [0, 0], sizes = [8, 32], strides = [1, 1]} : vector<8x96xf32> to vector<8x32xf32>
    %97 = vector.extract_strided_slice %93 {offsets = [0, 32], sizes = [8, 32], strides = [1, 1]} : vector<8x96xf32> to vector<8x32xf32>
    %98 = vector.extract_strided_slice %93 {offsets = [0, 64], sizes = [8, 32], strides = [1, 1]} : vector<8x96xf32> to vector<8x32xf32>
    %99 = arith.mulf %97, %54 : vector<8x32xf32>
    %100 = arith.mulf %96, %95 : vector<8x32xf32>
    %101 = arith.addf %99, %100 : vector<8x32xf32>
    %102 = math.tanh %101 : vector<8x32xf32>
    %103 = arith.mulf %98, %102 : vector<8x32xf32>
    %104 = arith.truncf %103 : vector<8x32xf32> to vector<8x32xbf16>
    %c1_i32_28 = arith.constant 1 : i32
    %105 = vector.broadcast %c1_i32_28 : i32 to vector<8x1xi32>
    %106 = arith.cmpi eq, %6, %105 : vector<8x1xi32>
    %107 = vector.shape_cast %106 : vector<8x1xi1> to vector<8x1xi1>
    %108 = vector.broadcast %107 : vector<8x1xi1> to vector<8x32xi1>
    %109 = arith.select %108, %103, %62 : vector<8x32xi1>, vector<8x32xf32>
    %cst_29 = arith.constant dense<0.000000e+00> : vector<8x128xf32>
    %110 = tpu.matmul %83, %0, %cst_29 {dimension_numbers = #tpu.dot_dimension_numbers<[1], [0], [0], [1], [0, 0, 1, 1], [], []>} : vector<8x32xbf16>, vector<32x128xbf16>, vector<8x128xf32> -> vector<8x128xf32>
    %cst_30 = arith.constant dense<0.000000e+00> : vector<8x128xf32>
    %111 = tpu.matmul %104, %2, %cst_30 {dimension_numbers = #tpu.dot_dimension_numbers<[1], [0], [0], [1], [0, 0, 1, 1], [], []>} : vector<8x32xbf16>, vector<32x128xbf16>, vector<8x128xf32> -> vector<8x128xf32>
    %112 = vector.extract_strided_slice %12 {offsets = [16, 0], sizes = [8, 128], strides = [1, 1]} : vector<64x128xf32> to vector<8x128xf32>
    %113 = arith.addf %112, %110 : vector<8x128xf32>
    %114 = vector.extract_strided_slice %113 {offsets = [0, 0], sizes = [8, 96], strides = [1, 1]} : vector<8x128xf32> to vector<8x96xf32>
    %115 = arith.negf %114 : vector<8x96xf32>
    %116 = math.exp %115 : vector<8x96xf32>
    %cst_31 = arith.constant 1.000000e+00 : f32
    %117 = vector.broadcast %cst_31 : f32 to vector<8x96xf32>
    %118 = arith.addf %117, %116 : vector<8x96xf32>
    %119 = arith.divf %117, %118 : vector<8x96xf32>
    %120 = vector.extract_strided_slice %113 {offsets = [0, 96], sizes = [8, 32], strides = [1, 1]} : vector<8x128xf32> to vector<8x32xf32>
    %121 = math.tanh %120 : vector<8x32xf32>
    %122 = vector.extract_strided_slice %119 {offsets = [0, 0], sizes = [8, 32], strides = [1, 1]} : vector<8x96xf32> to vector<8x32xf32>
    %123 = vector.extract_strided_slice %119 {offsets = [0, 32], sizes = [8, 32], strides = [1, 1]} : vector<8x96xf32> to vector<8x32xf32>
    %124 = vector.extract_strided_slice %119 {offsets = [0, 64], sizes = [8, 32], strides = [1, 1]} : vector<8x96xf32> to vector<8x32xf32>
    %125 = arith.mulf %123, %80 : vector<8x32xf32>
    %126 = arith.mulf %122, %121 : vector<8x32xf32>
    %127 = arith.addf %125, %126 : vector<8x32xf32>
    %128 = math.tanh %127 : vector<8x32xf32>
    %129 = arith.mulf %124, %128 : vector<8x32xf32>
    %130 = arith.truncf %129 : vector<8x32xf32> to vector<8x32xbf16>
    %cst_32 = arith.constant dense<0.000000e+00> : vector<8x128xf32>
    %131 = tpu.matmul %130, %1, %cst_32 {dimension_numbers = #tpu.dot_dimension_numbers<[1], [0], [0], [1], [0, 0, 1, 1], [], []>} : vector<8x32xbf16>, vector<32x128xbf16>, vector<8x128xf32> -> vector<8x128xf32>
    %132 = arith.addf %131, %111 : vector<8x128xf32>
    %133 = vector.broadcast %3 : vector<1x128xf32> to vector<8x128xf32>
    %134 = arith.addf %132, %133 : vector<8x128xf32>
    %135 = vector.extract_strided_slice %134 {offsets = [0, 0], sizes = [8, 96], strides = [1, 1]} : vector<8x128xf32> to vector<8x96xf32>
    %136 = arith.negf %135 : vector<8x96xf32>
    %137 = math.exp %136 : vector<8x96xf32>
    %cst_33 = arith.constant 1.000000e+00 : f32
    %138 = vector.broadcast %cst_33 : f32 to vector<8x96xf32>
    %139 = arith.addf %138, %137 : vector<8x96xf32>
    %140 = arith.divf %138, %139 : vector<8x96xf32>
    %141 = vector.extract_strided_slice %134 {offsets = [0, 96], sizes = [8, 32], strides = [1, 1]} : vector<8x128xf32> to vector<8x32xf32>
    %142 = math.tanh %141 : vector<8x32xf32>
    %143 = vector.extract_strided_slice %140 {offsets = [0, 0], sizes = [8, 32], strides = [1, 1]} : vector<8x96xf32> to vector<8x32xf32>
    %144 = vector.extract_strided_slice %140 {offsets = [0, 32], sizes = [8, 32], strides = [1, 1]} : vector<8x96xf32> to vector<8x32xf32>
    %145 = vector.extract_strided_slice %140 {offsets = [0, 64], sizes = [8, 32], strides = [1, 1]} : vector<8x96xf32> to vector<8x32xf32>
    %146 = arith.mulf %144, %101 : vector<8x32xf32>
    %147 = arith.mulf %143, %142 : vector<8x32xf32>
    %148 = arith.addf %146, %147 : vector<8x32xf32>
    %149 = math.tanh %148 : vector<8x32xf32>
    %150 = arith.mulf %145, %149 : vector<8x32xf32>
    %151 = arith.truncf %150 : vector<8x32xf32> to vector<8x32xbf16>
    %c2_i32 = arith.constant 2 : i32
    %152 = vector.broadcast %c2_i32 : i32 to vector<8x1xi32>
    %153 = arith.cmpi eq, %6, %152 : vector<8x1xi32>
    %154 = vector.shape_cast %153 : vector<8x1xi1> to vector<8x1xi1>
    %155 = vector.broadcast %154 : vector<8x1xi1> to vector<8x32xi1>
    %156 = arith.select %155, %150, %109 : vector<8x32xi1>, vector<8x32xf32>
    %cst_34 = arith.constant dense<0.000000e+00> : vector<8x128xf32>
    %157 = tpu.matmul %130, %0, %cst_34 {dimension_numbers = #tpu.dot_dimension_numbers<[1], [0], [0], [1], [0, 0, 1, 1], [], []>} : vector<8x32xbf16>, vector<32x128xbf16>, vector<8x128xf32> -> vector<8x128xf32>
    %cst_35 = arith.constant dense<0.000000e+00> : vector<8x128xf32>
    %158 = tpu.matmul %151, %2, %cst_35 {dimension_numbers = #tpu.dot_dimension_numbers<[1], [0], [0], [1], [0, 0, 1, 1], [], []>} : vector<8x32xbf16>, vector<32x128xbf16>, vector<8x128xf32> -> vector<8x128xf32>
    %159 = vector.extract_strided_slice %12 {offsets = [24, 0], sizes = [8, 128], strides = [1, 1]} : vector<64x128xf32> to vector<8x128xf32>
    %160 = arith.addf %159, %157 : vector<8x128xf32>
    %161 = vector.extract_strided_slice %160 {offsets = [0, 0], sizes = [8, 96], strides = [1, 1]} : vector<8x128xf32> to vector<8x96xf32>
    %162 = arith.negf %161 : vector<8x96xf32>
    %163 = math.exp %162 : vector<8x96xf32>
    %cst_36 = arith.constant 1.000000e+00 : f32
    %164 = vector.broadcast %cst_36 : f32 to vector<8x96xf32>
    %165 = arith.addf %164, %163 : vector<8x96xf32>
    %166 = arith.divf %164, %165 : vector<8x96xf32>
    %167 = vector.extract_strided_slice %160 {offsets = [0, 96], sizes = [8, 32], strides = [1, 1]} : vector<8x128xf32> to vector<8x32xf32>
    %168 = math.tanh %167 : vector<8x32xf32>
    %169 = vector.extract_strided_slice %166 {offsets = [0, 0], sizes = [8, 32], strides = [1, 1]} : vector<8x96xf32> to vector<8x32xf32>
    %170 = vector.extract_strided_slice %166 {offsets = [0, 32], sizes = [8, 32], strides = [1, 1]} : vector<8x96xf32> to vector<8x32xf32>
    %171 = vector.extract_strided_slice %166 {offsets = [0, 64], sizes = [8, 32], strides = [1, 1]} : vector<8x96xf32> to vector<8x32xf32>
    %172 = arith.mulf %170, %127 : vector<8x32xf32>
    %173 = arith.mulf %169, %168 : vector<8x32xf32>
    %174 = arith.addf %172, %173 : vector<8x32xf32>
    %175 = math.tanh %174 : vector<8x32xf32>
    %176 = arith.mulf %171, %175 : vector<8x32xf32>
    %177 = arith.truncf %176 : vector<8x32xf32> to vector<8x32xbf16>
    %cst_37 = arith.constant dense<0.000000e+00> : vector<8x128xf32>
    %178 = tpu.matmul %177, %1, %cst_37 {dimension_numbers = #tpu.dot_dimension_numbers<[1], [0], [0], [1], [0, 0, 1, 1], [], []>} : vector<8x32xbf16>, vector<32x128xbf16>, vector<8x128xf32> -> vector<8x128xf32>
    %179 = arith.addf %178, %158 : vector<8x128xf32>
    %180 = vector.broadcast %3 : vector<1x128xf32> to vector<8x128xf32>
    %181 = arith.addf %179, %180 : vector<8x128xf32>
    %182 = vector.extract_strided_slice %181 {offsets = [0, 0], sizes = [8, 96], strides = [1, 1]} : vector<8x128xf32> to vector<8x96xf32>
    %183 = arith.negf %182 : vector<8x96xf32>
    %184 = math.exp %183 : vector<8x96xf32>
    %cst_38 = arith.constant 1.000000e+00 : f32
    %185 = vector.broadcast %cst_38 : f32 to vector<8x96xf32>
    %186 = arith.addf %185, %184 : vector<8x96xf32>
    %187 = arith.divf %185, %186 : vector<8x96xf32>
    %188 = vector.extract_strided_slice %181 {offsets = [0, 96], sizes = [8, 32], strides = [1, 1]} : vector<8x128xf32> to vector<8x32xf32>
    %189 = math.tanh %188 : vector<8x32xf32>
    %190 = vector.extract_strided_slice %187 {offsets = [0, 0], sizes = [8, 32], strides = [1, 1]} : vector<8x96xf32> to vector<8x32xf32>
    %191 = vector.extract_strided_slice %187 {offsets = [0, 32], sizes = [8, 32], strides = [1, 1]} : vector<8x96xf32> to vector<8x32xf32>
    %192 = vector.extract_strided_slice %187 {offsets = [0, 64], sizes = [8, 32], strides = [1, 1]} : vector<8x96xf32> to vector<8x32xf32>
    %193 = arith.mulf %191, %148 : vector<8x32xf32>
    %194 = arith.mulf %190, %189 : vector<8x32xf32>
    %195 = arith.addf %193, %194 : vector<8x32xf32>
    %196 = math.tanh %195 : vector<8x32xf32>
    %197 = arith.mulf %192, %196 : vector<8x32xf32>
    %198 = arith.truncf %197 : vector<8x32xf32> to vector<8x32xbf16>
    %c3_i32 = arith.constant 3 : i32
    %199 = vector.broadcast %c3_i32 : i32 to vector<8x1xi32>
    %200 = arith.cmpi eq, %6, %199 : vector<8x1xi32>
    %201 = vector.shape_cast %200 : vector<8x1xi1> to vector<8x1xi1>
    %202 = vector.broadcast %201 : vector<8x1xi1> to vector<8x32xi1>
    %203 = arith.select %202, %197, %156 : vector<8x32xi1>, vector<8x32xf32>
    %cst_39 = arith.constant dense<0.000000e+00> : vector<8x128xf32>
    %204 = tpu.matmul %177, %0, %cst_39 {dimension_numbers = #tpu.dot_dimension_numbers<[1], [0], [0], [1], [0, 0, 1, 1], [], []>} : vector<8x32xbf16>, vector<32x128xbf16>, vector<8x128xf32> -> vector<8x128xf32>
    %cst_40 = arith.constant dense<0.000000e+00> : vector<8x128xf32>
    %205 = tpu.matmul %198, %2, %cst_40 {dimension_numbers = #tpu.dot_dimension_numbers<[1], [0], [0], [1], [0, 0, 1, 1], [], []>} : vector<8x32xbf16>, vector<32x128xbf16>, vector<8x128xf32> -> vector<8x128xf32>
    %206 = vector.extract_strided_slice %12 {offsets = [32, 0], sizes = [8, 128], strides = [1, 1]} : vector<64x128xf32> to vector<8x128xf32>
    %207 = arith.addf %206, %204 : vector<8x128xf32>
    %208 = vector.extract_strided_slice %207 {offsets = [0, 0], sizes = [8, 96], strides = [1, 1]} : vector<8x128xf32> to vector<8x96xf32>
    %209 = arith.negf %208 : vector<8x96xf32>
    %210 = math.exp %209 : vector<8x96xf32>
    %cst_41 = arith.constant 1.000000e+00 : f32
    %211 = vector.broadcast %cst_41 : f32 to vector<8x96xf32>
    %212 = arith.addf %211, %210 : vector<8x96xf32>
    %213 = arith.divf %211, %212 : vector<8x96xf32>
    %214 = vector.extract_strided_slice %207 {offsets = [0, 96], sizes = [8, 32], strides = [1, 1]} : vector<8x128xf32> to vector<8x32xf32>
    %215 = math.tanh %214 : vector<8x32xf32>
    %216 = vector.extract_strided_slice %213 {offsets = [0, 0], sizes = [8, 32], strides = [1, 1]} : vector<8x96xf32> to vector<8x32xf32>
    %217 = vector.extract_strided_slice %213 {offsets = [0, 32], sizes = [8, 32], strides = [1, 1]} : vector<8x96xf32> to vector<8x32xf32>
    %218 = vector.extract_strided_slice %213 {offsets = [0, 64], sizes = [8, 32], strides = [1, 1]} : vector<8x96xf32> to vector<8x32xf32>
    %219 = arith.mulf %217, %174 : vector<8x32xf32>
    %220 = arith.mulf %216, %215 : vector<8x32xf32>
    %221 = arith.addf %219, %220 : vector<8x32xf32>
    %222 = math.tanh %221 : vector<8x32xf32>
    %223 = arith.mulf %218, %222 : vector<8x32xf32>
    %224 = arith.truncf %223 : vector<8x32xf32> to vector<8x32xbf16>
    %cst_42 = arith.constant dense<0.000000e+00> : vector<8x128xf32>
    %225 = tpu.matmul %224, %1, %cst_42 {dimension_numbers = #tpu.dot_dimension_numbers<[1], [0], [0], [1], [0, 0, 1, 1], [], []>} : vector<8x32xbf16>, vector<32x128xbf16>, vector<8x128xf32> -> vector<8x128xf32>
    %226 = arith.addf %225, %205 : vector<8x128xf32>
    %227 = vector.broadcast %3 : vector<1x128xf32> to vector<8x128xf32>
    %228 = arith.addf %226, %227 : vector<8x128xf32>
    %229 = vector.extract_strided_slice %228 {offsets = [0, 0], sizes = [8, 96], strides = [1, 1]} : vector<8x128xf32> to vector<8x96xf32>
    %230 = arith.negf %229 : vector<8x96xf32>
    %231 = math.exp %230 : vector<8x96xf32>
    %cst_43 = arith.constant 1.000000e+00 : f32
    %232 = vector.broadcast %cst_43 : f32 to vector<8x96xf32>
    %233 = arith.addf %232, %231 : vector<8x96xf32>
    %234 = arith.divf %232, %233 : vector<8x96xf32>
    %235 = vector.extract_strided_slice %228 {offsets = [0, 96], sizes = [8, 32], strides = [1, 1]} : vector<8x128xf32> to vector<8x32xf32>
    %236 = math.tanh %235 : vector<8x32xf32>
    %237 = vector.extract_strided_slice %234 {offsets = [0, 0], sizes = [8, 32], strides = [1, 1]} : vector<8x96xf32> to vector<8x32xf32>
    %238 = vector.extract_strided_slice %234 {offsets = [0, 32], sizes = [8, 32], strides = [1, 1]} : vector<8x96xf32> to vector<8x32xf32>
    %239 = vector.extract_strided_slice %234 {offsets = [0, 64], sizes = [8, 32], strides = [1, 1]} : vector<8x96xf32> to vector<8x32xf32>
    %240 = arith.mulf %238, %195 : vector<8x32xf32>
    %241 = arith.mulf %237, %236 : vector<8x32xf32>
    %242 = arith.addf %240, %241 : vector<8x32xf32>
    %243 = math.tanh %242 : vector<8x32xf32>
    %244 = arith.mulf %239, %243 : vector<8x32xf32>
    %245 = arith.truncf %244 : vector<8x32xf32> to vector<8x32xbf16>
    %c4_i32 = arith.constant 4 : i32
    %246 = vector.broadcast %c4_i32 : i32 to vector<8x1xi32>
    %247 = arith.cmpi eq, %6, %246 : vector<8x1xi32>
    %248 = vector.shape_cast %247 : vector<8x1xi1> to vector<8x1xi1>
    %249 = vector.broadcast %248 : vector<8x1xi1> to vector<8x32xi1>
    %250 = arith.select %249, %244, %203 : vector<8x32xi1>, vector<8x32xf32>
    %cst_44 = arith.constant dense<0.000000e+00> : vector<8x128xf32>
    %251 = tpu.matmul %224, %0, %cst_44 {dimension_numbers = #tpu.dot_dimension_numbers<[1], [0], [0], [1], [0, 0, 1, 1], [], []>} : vector<8x32xbf16>, vector<32x128xbf16>, vector<8x128xf32> -> vector<8x128xf32>
    %cst_45 = arith.constant dense<0.000000e+00> : vector<8x128xf32>
    %252 = tpu.matmul %245, %2, %cst_45 {dimension_numbers = #tpu.dot_dimension_numbers<[1], [0], [0], [1], [0, 0, 1, 1], [], []>} : vector<8x32xbf16>, vector<32x128xbf16>, vector<8x128xf32> -> vector<8x128xf32>
    %253 = vector.extract_strided_slice %12 {offsets = [40, 0], sizes = [8, 128], strides = [1, 1]} : vector<64x128xf32> to vector<8x128xf32>
    %254 = arith.addf %253, %251 : vector<8x128xf32>
    %255 = vector.extract_strided_slice %254 {offsets = [0, 0], sizes = [8, 96], strides = [1, 1]} : vector<8x128xf32> to vector<8x96xf32>
    %256 = arith.negf %255 : vector<8x96xf32>
    %257 = math.exp %256 : vector<8x96xf32>
    %cst_46 = arith.constant 1.000000e+00 : f32
    %258 = vector.broadcast %cst_46 : f32 to vector<8x96xf32>
    %259 = arith.addf %258, %257 : vector<8x96xf32>
    %260 = arith.divf %258, %259 : vector<8x96xf32>
    %261 = vector.extract_strided_slice %254 {offsets = [0, 96], sizes = [8, 32], strides = [1, 1]} : vector<8x128xf32> to vector<8x32xf32>
    %262 = math.tanh %261 : vector<8x32xf32>
    %263 = vector.extract_strided_slice %260 {offsets = [0, 0], sizes = [8, 32], strides = [1, 1]} : vector<8x96xf32> to vector<8x32xf32>
    %264 = vector.extract_strided_slice %260 {offsets = [0, 32], sizes = [8, 32], strides = [1, 1]} : vector<8x96xf32> to vector<8x32xf32>
    %265 = vector.extract_strided_slice %260 {offsets = [0, 64], sizes = [8, 32], strides = [1, 1]} : vector<8x96xf32> to vector<8x32xf32>
    %266 = arith.mulf %264, %221 : vector<8x32xf32>
    %267 = arith.mulf %263, %262 : vector<8x32xf32>
    %268 = arith.addf %266, %267 : vector<8x32xf32>
    %269 = math.tanh %268 : vector<8x32xf32>
    %270 = arith.mulf %265, %269 : vector<8x32xf32>
    %271 = arith.truncf %270 : vector<8x32xf32> to vector<8x32xbf16>
    %cst_47 = arith.constant dense<0.000000e+00> : vector<8x128xf32>
    %272 = tpu.matmul %271, %1, %cst_47 {dimension_numbers = #tpu.dot_dimension_numbers<[1], [0], [0], [1], [0, 0, 1, 1], [], []>} : vector<8x32xbf16>, vector<32x128xbf16>, vector<8x128xf32> -> vector<8x128xf32>
    %273 = arith.addf %272, %252 : vector<8x128xf32>
    %274 = vector.broadcast %3 : vector<1x128xf32> to vector<8x128xf32>
    %275 = arith.addf %273, %274 : vector<8x128xf32>
    %276 = vector.extract_strided_slice %275 {offsets = [0, 0], sizes = [8, 96], strides = [1, 1]} : vector<8x128xf32> to vector<8x96xf32>
    %277 = arith.negf %276 : vector<8x96xf32>
    %278 = math.exp %277 : vector<8x96xf32>
    %cst_48 = arith.constant 1.000000e+00 : f32
    %279 = vector.broadcast %cst_48 : f32 to vector<8x96xf32>
    %280 = arith.addf %279, %278 : vector<8x96xf32>
    %281 = arith.divf %279, %280 : vector<8x96xf32>
    %282 = vector.extract_strided_slice %275 {offsets = [0, 96], sizes = [8, 32], strides = [1, 1]} : vector<8x128xf32> to vector<8x32xf32>
    %283 = math.tanh %282 : vector<8x32xf32>
    %284 = vector.extract_strided_slice %281 {offsets = [0, 0], sizes = [8, 32], strides = [1, 1]} : vector<8x96xf32> to vector<8x32xf32>
    %285 = vector.extract_strided_slice %281 {offsets = [0, 32], sizes = [8, 32], strides = [1, 1]} : vector<8x96xf32> to vector<8x32xf32>
    %286 = vector.extract_strided_slice %281 {offsets = [0, 64], sizes = [8, 32], strides = [1, 1]} : vector<8x96xf32> to vector<8x32xf32>
    %287 = arith.mulf %285, %242 : vector<8x32xf32>
    %288 = arith.mulf %284, %283 : vector<8x32xf32>
    %289 = arith.addf %287, %288 : vector<8x32xf32>
    %290 = math.tanh %289 : vector<8x32xf32>
    %291 = arith.mulf %286, %290 : vector<8x32xf32>
    %292 = arith.truncf %291 : vector<8x32xf32> to vector<8x32xbf16>
    %c5_i32 = arith.constant 5 : i32
    %293 = vector.broadcast %c5_i32 : i32 to vector<8x1xi32>
    %294 = arith.cmpi eq, %6, %293 : vector<8x1xi32>
    %295 = vector.shape_cast %294 : vector<8x1xi1> to vector<8x1xi1>
    %296 = vector.broadcast %295 : vector<8x1xi1> to vector<8x32xi1>
    %297 = arith.select %296, %291, %250 : vector<8x32xi1>, vector<8x32xf32>
    %cst_49 = arith.constant dense<0.000000e+00> : vector<8x128xf32>
    %298 = tpu.matmul %271, %0, %cst_49 {dimension_numbers = #tpu.dot_dimension_numbers<[1], [0], [0], [1], [0, 0, 1, 1], [], []>} : vector<8x32xbf16>, vector<32x128xbf16>, vector<8x128xf32> -> vector<8x128xf32>
    %cst_50 = arith.constant dense<0.000000e+00> : vector<8x128xf32>
    %299 = tpu.matmul %292, %2, %cst_50 {dimension_numbers = #tpu.dot_dimension_numbers<[1], [0], [0], [1], [0, 0, 1, 1], [], []>} : vector<8x32xbf16>, vector<32x128xbf16>, vector<8x128xf32> -> vector<8x128xf32>
    %300 = vector.extract_strided_slice %12 {offsets = [48, 0], sizes = [8, 128], strides = [1, 1]} : vector<64x128xf32> to vector<8x128xf32>
    %301 = arith.addf %300, %298 : vector<8x128xf32>
    %302 = vector.extract_strided_slice %301 {offsets = [0, 0], sizes = [8, 96], strides = [1, 1]} : vector<8x128xf32> to vector<8x96xf32>
    %303 = arith.negf %302 : vector<8x96xf32>
    %304 = math.exp %303 : vector<8x96xf32>
    %cst_51 = arith.constant 1.000000e+00 : f32
    %305 = vector.broadcast %cst_51 : f32 to vector<8x96xf32>
    %306 = arith.addf %305, %304 : vector<8x96xf32>
    %307 = arith.divf %305, %306 : vector<8x96xf32>
    %308 = vector.extract_strided_slice %301 {offsets = [0, 96], sizes = [8, 32], strides = [1, 1]} : vector<8x128xf32> to vector<8x32xf32>
    %309 = math.tanh %308 : vector<8x32xf32>
    %310 = vector.extract_strided_slice %307 {offsets = [0, 0], sizes = [8, 32], strides = [1, 1]} : vector<8x96xf32> to vector<8x32xf32>
    %311 = vector.extract_strided_slice %307 {offsets = [0, 32], sizes = [8, 32], strides = [1, 1]} : vector<8x96xf32> to vector<8x32xf32>
    %312 = vector.extract_strided_slice %307 {offsets = [0, 64], sizes = [8, 32], strides = [1, 1]} : vector<8x96xf32> to vector<8x32xf32>
    %313 = arith.mulf %311, %268 : vector<8x32xf32>
    %314 = arith.mulf %310, %309 : vector<8x32xf32>
    %315 = arith.addf %313, %314 : vector<8x32xf32>
    %316 = math.tanh %315 : vector<8x32xf32>
    %317 = arith.mulf %312, %316 : vector<8x32xf32>
    %318 = arith.truncf %317 : vector<8x32xf32> to vector<8x32xbf16>
    %cst_52 = arith.constant dense<0.000000e+00> : vector<8x128xf32>
    %319 = tpu.matmul %318, %1, %cst_52 {dimension_numbers = #tpu.dot_dimension_numbers<[1], [0], [0], [1], [0, 0, 1, 1], [], []>} : vector<8x32xbf16>, vector<32x128xbf16>, vector<8x128xf32> -> vector<8x128xf32>
    %320 = arith.addf %319, %299 : vector<8x128xf32>
    %321 = vector.broadcast %3 : vector<1x128xf32> to vector<8x128xf32>
    %322 = arith.addf %320, %321 : vector<8x128xf32>
    %323 = vector.extract_strided_slice %322 {offsets = [0, 0], sizes = [8, 96], strides = [1, 1]} : vector<8x128xf32> to vector<8x96xf32>
    %324 = arith.negf %323 : vector<8x96xf32>
    %325 = math.exp %324 : vector<8x96xf32>
    %cst_53 = arith.constant 1.000000e+00 : f32
    %326 = vector.broadcast %cst_53 : f32 to vector<8x96xf32>
    %327 = arith.addf %326, %325 : vector<8x96xf32>
    %328 = arith.divf %326, %327 : vector<8x96xf32>
    %329 = vector.extract_strided_slice %322 {offsets = [0, 96], sizes = [8, 32], strides = [1, 1]} : vector<8x128xf32> to vector<8x32xf32>
    %330 = math.tanh %329 : vector<8x32xf32>
    %331 = vector.extract_strided_slice %328 {offsets = [0, 0], sizes = [8, 32], strides = [1, 1]} : vector<8x96xf32> to vector<8x32xf32>
    %332 = vector.extract_strided_slice %328 {offsets = [0, 32], sizes = [8, 32], strides = [1, 1]} : vector<8x96xf32> to vector<8x32xf32>
    %333 = vector.extract_strided_slice %328 {offsets = [0, 64], sizes = [8, 32], strides = [1, 1]} : vector<8x96xf32> to vector<8x32xf32>
    %334 = arith.mulf %332, %289 : vector<8x32xf32>
    %335 = arith.mulf %331, %330 : vector<8x32xf32>
    %336 = arith.addf %334, %335 : vector<8x32xf32>
    %337 = math.tanh %336 : vector<8x32xf32>
    %338 = arith.mulf %333, %337 : vector<8x32xf32>
    %339 = arith.truncf %338 : vector<8x32xf32> to vector<8x32xbf16>
    %c6_i32 = arith.constant 6 : i32
    %340 = vector.broadcast %c6_i32 : i32 to vector<8x1xi32>
    %341 = arith.cmpi eq, %6, %340 : vector<8x1xi32>
    %342 = vector.shape_cast %341 : vector<8x1xi1> to vector<8x1xi1>
    %343 = vector.broadcast %342 : vector<8x1xi1> to vector<8x32xi1>
    %344 = arith.select %343, %338, %297 : vector<8x32xi1>, vector<8x32xf32>
    %cst_54 = arith.constant dense<0.000000e+00> : vector<8x128xf32>
    %345 = tpu.matmul %318, %0, %cst_54 {dimension_numbers = #tpu.dot_dimension_numbers<[1], [0], [0], [1], [0, 0, 1, 1], [], []>} : vector<8x32xbf16>, vector<32x128xbf16>, vector<8x128xf32> -> vector<8x128xf32>
    %cst_55 = arith.constant dense<0.000000e+00> : vector<8x128xf32>
    %346 = tpu.matmul %339, %2, %cst_55 {dimension_numbers = #tpu.dot_dimension_numbers<[1], [0], [0], [1], [0, 0, 1, 1], [], []>} : vector<8x32xbf16>, vector<32x128xbf16>, vector<8x128xf32> -> vector<8x128xf32>
    %347 = vector.extract_strided_slice %12 {offsets = [56, 0], sizes = [8, 128], strides = [1, 1]} : vector<64x128xf32> to vector<8x128xf32>
    %348 = arith.addf %347, %345 : vector<8x128xf32>
    %349 = vector.extract_strided_slice %348 {offsets = [0, 0], sizes = [8, 96], strides = [1, 1]} : vector<8x128xf32> to vector<8x96xf32>
    %350 = arith.negf %349 : vector<8x96xf32>
    %351 = math.exp %350 : vector<8x96xf32>
    %cst_56 = arith.constant 1.000000e+00 : f32
    %352 = vector.broadcast %cst_56 : f32 to vector<8x96xf32>
    %353 = arith.addf %352, %351 : vector<8x96xf32>
    %354 = arith.divf %352, %353 : vector<8x96xf32>
    %355 = vector.extract_strided_slice %348 {offsets = [0, 96], sizes = [8, 32], strides = [1, 1]} : vector<8x128xf32> to vector<8x32xf32>
    %356 = math.tanh %355 : vector<8x32xf32>
    %357 = vector.extract_strided_slice %354 {offsets = [0, 0], sizes = [8, 32], strides = [1, 1]} : vector<8x96xf32> to vector<8x32xf32>
    %358 = vector.extract_strided_slice %354 {offsets = [0, 32], sizes = [8, 32], strides = [1, 1]} : vector<8x96xf32> to vector<8x32xf32>
    %359 = vector.extract_strided_slice %354 {offsets = [0, 64], sizes = [8, 32], strides = [1, 1]} : vector<8x96xf32> to vector<8x32xf32>
    %360 = arith.mulf %358, %315 : vector<8x32xf32>
    %361 = arith.mulf %357, %356 : vector<8x32xf32>
    %362 = arith.addf %360, %361 : vector<8x32xf32>
    %363 = math.tanh %362 : vector<8x32xf32>
    %364 = arith.mulf %359, %363 : vector<8x32xf32>
    %365 = arith.truncf %364 : vector<8x32xf32> to vector<8x32xbf16>
    %cst_57 = arith.constant dense<0.000000e+00> : vector<8x128xf32>
    %366 = tpu.matmul %365, %1, %cst_57 {dimension_numbers = #tpu.dot_dimension_numbers<[1], [0], [0], [1], [0, 0, 1, 1], [], []>} : vector<8x32xbf16>, vector<32x128xbf16>, vector<8x128xf32> -> vector<8x128xf32>
    %367 = arith.addf %366, %346 : vector<8x128xf32>
    %368 = vector.broadcast %3 : vector<1x128xf32> to vector<8x128xf32>
    %369 = arith.addf %367, %368 : vector<8x128xf32>
    %370 = vector.extract_strided_slice %369 {offsets = [0, 0], sizes = [8, 96], strides = [1, 1]} : vector<8x128xf32> to vector<8x96xf32>
    %371 = arith.negf %370 : vector<8x96xf32>
    %372 = math.exp %371 : vector<8x96xf32>
    %cst_58 = arith.constant 1.000000e+00 : f32
    %373 = vector.broadcast %cst_58 : f32 to vector<8x96xf32>
    %374 = arith.addf %373, %372 : vector<8x96xf32>
    %375 = arith.divf %373, %374 : vector<8x96xf32>
    %376 = vector.extract_strided_slice %369 {offsets = [0, 96], sizes = [8, 32], strides = [1, 1]} : vector<8x128xf32> to vector<8x32xf32>
    %377 = math.tanh %376 : vector<8x32xf32>
    %378 = vector.extract_strided_slice %375 {offsets = [0, 0], sizes = [8, 32], strides = [1, 1]} : vector<8x96xf32> to vector<8x32xf32>
    %379 = vector.extract_strided_slice %375 {offsets = [0, 32], sizes = [8, 32], strides = [1, 1]} : vector<8x96xf32> to vector<8x32xf32>
    %380 = vector.extract_strided_slice %375 {offsets = [0, 64], sizes = [8, 32], strides = [1, 1]} : vector<8x96xf32> to vector<8x32xf32>
    %381 = arith.mulf %379, %336 : vector<8x32xf32>
    %382 = arith.mulf %378, %377 : vector<8x32xf32>
    %383 = arith.addf %381, %382 : vector<8x32xf32>
    %384 = math.tanh %383 : vector<8x32xf32>
    %385 = arith.mulf %380, %384 : vector<8x32xf32>
    %c7_i32 = arith.constant 7 : i32
    %386 = vector.broadcast %c7_i32 : i32 to vector<8x1xi32>
    %387 = arith.cmpi eq, %6, %386 : vector<8x1xi32>
    %388 = vector.shape_cast %387 : vector<8x1xi1> to vector<8x1xi1>
    %389 = vector.broadcast %388 : vector<8x1xi1> to vector<8x32xi1>
    %390 = arith.select %389, %385, %344 : vector<8x32xi1>, vector<8x32xf32>
    %c0_59 = arith.constant 0 : index
    %c0_60 = arith.constant 0 : index
    %391 = vector.load %arg8[%c0_59, %c0_60] : memref<1x32xf32, #tpu.memory_space<vmem>>, vector<1x32xf32>
    %392 = vector.broadcast %391 : vector<1x32xf32> to vector<8x32xf32>
    %393 = arith.mulf %390, %392 : vector<8x32xf32>
    %cst_61 = arith.constant dense<0.000000e+00> : vector<8xf32>
    %394 = vector.multi_reduction <add>, %393, %cst_61 [1] : vector<8x32xf32> to vector<8xf32>
    %395 = vector.shape_cast %394 : vector<8xf32> to vector<8x1xf32>
    %c0_62 = arith.constant 0 : index
    %c0_63 = arith.constant 0 : index
    %396 = vector.load %arg9[%c0_62, %c0_63] : memref<1x1xf32, #tpu.memory_space<vmem>>, vector<1x1xf32>
    %397 = vector.broadcast %396 : vector<1x1xf32> to vector<8x1xf32>
    %398 = arith.addf %395, %397 : vector<8x1xf32>
    %c0_64 = arith.constant 0 : index
    %c0_65 = arith.constant 0 : index
    %399 = vector.load %arg10[%c0_64, %c0_65] : memref<8x1xf32, #tpu.memory_space<vmem>>, vector<8x1xf32>
    tpu.vector_store %arg10[%c0_64, %c0_65], %398 {strides = array<i32>} : memref<8x1xf32, #tpu.memory_space<vmem>>, vector<8x1xf32>,
    return
  }
}

</mosaic_0001>

<bundles_post_ra>
// kernel: tpu_custom_call.1
= control target key start
LH: loop header
LB: loop body
LE: loop exit
PB: predicated region body
PF: predicated region fallthrough
CT: control target
= control target key end

     0   :  { %v2275_v1 = vmov 0.0   ;;  %vm2276_vm0 = vmmov 0   ;;  %v2277_v3 = vmov 0   ;;  %vm104_vm1 = vcmask 261120   ;;  %s2278_s26 = smov 32   ;;  %s2279_s18 = smov 64   ;;  %s2797_s2 = inlined_call_operand.vmem [shape: bf16[32,128], index: 2, kind: input, shape index: {}]   ;;  %s2798_s3 = inlined_call_operand.vmem [shape: bf16[32,128], index: 3, kind: input, shape index: {}]   ;;  %s2799_s0 = inlined_call_operand.vmem [shape: bf16[64,32], index: 0, kind: input, shape index: {}]   ;;  %s2800_s4 = inlined_call_operand.vmem [shape: f32[1,128], index: 4, kind: input, shape index: {}]   ;;  %s2801_s6 = inlined_call_operand.vmem [shape: bf16[32,128], index: 6, kind: input, shape index: {}]   ;;  %s2802_s5 = inlined_call_operand.vmem [shape: bf16[32,128], index: 5, kind: input, shape index: {}]   ;;  %s2803_s7 = inlined_call_operand.vmem [shape: f32[1,128], index: 7, kind: input, shape index: {}]   ;;  %s2804_s1 = inlined_call_operand.vmem [shape: s32[8,1], index: 1, kind: input, shape index: {}]   ;;  %s2805_s8 = inlined_call_operand.vmem [shape: f32[1,32], index: 8, kind: input, shape index: {}]   ;;  %s2806_s9 = inlined_call_operand.<no memory space> [shape: f32[1,1], index: 9, kind: input, shape index: {}]   ;;  %s2807_s10 = inlined_call_operand.vmem [shape: f32[8,1], index: 10, kind: output, shape index: {}]  }
   0x1   :  { %v2127_v0 = vld [vmem:[%s2797_s2] sm:$0xff]   ;;  %1928 = vmatprep.subr.bf16.mxu1 %v2275_v1  ;;  %1932 = vmatprep.mubr.msk.bf16.mxu1 %vm2276_vm0, %v2275_v1  ;;  %v2129_v4 = vld [vmem:[%s2797_s2 + $0x8] sm:$0xff]   ;;  %v2135_v29 = vld [vmem:[%s2799_s0 + $0x10] sm:$0xff]  }
   0x2   :  { %v2344_v2 = vld [vmem:[%s2798_s3] sm:$0xff]   ;;  %2125 = vset.pattern.permute.xlu0 %v2277_v3  ;;  %2126 = vset.pattern.permute.xlu1 %v2277_v3  ;;  %v2355_v5 = vld [vmem:[%s2798_s3 + $0x8] sm:$0xff]   ;;  %v2137_v30 = vld [vmem:[%s2799_s0 + $0x18] sm:$0xff]  }
   0x3   :  { %1916 = vmatprep.subr.bf16.mxu0 %v2127_v0  ;;  %1929 = vmatpush3.bf16.msra.mxu1 %v2344_v2  ;;  %v2131_v6 = vld [vmem:[%s2799_s0] sm:$0xff]   ;;  %v2132_v7 = vld [vmem:[%s2799_s0 + $0x8] sm:$0xff]  }
   0x4   :  { %1917 = vmatpush3.bf16.msra.mxu0 %v2127_v0  ;;  %1930 = vmatprep.subr.bf16.mxu1 %v2275_v1  ;;  %v2375_v8 = vld [vmem:[%s2800_s4] ss:$0 sm:$0xff]  ;;  %v2410_v33 = vld [vmem:[%s2801_s6 + $0x8] sm:$0xff]  }
   0x5   :  { %1918 = vmatprep.subr.bf16.mxu0 %v2129_v4  ;;  %1920 = vmatprep.mubr.msk.bf16.mxu0 %vm104_vm1, %v2131_v6  ;;  %v2398_v31 = vld [vmem:[%s2801_s6] sm:$0xff]   ;;  %v2418_v34 = vld [vmem:[%s2802_s5 + $0x8] sm:$0xff]  }
   0x6   :  { %v2403_v32 = vld [vmem:[%s2802_s5] sm:$0xff]  }
   0x7   :  { %1931 = vmatpush3.bf16.msra.mxu1 %v2355_v5  ;;  %v2463_v49 = vld [vmem:[%s2803_s7] ss:$0 sm:$0xff] }
   0x8   :  { %1919 = vmatpush3.bf16.msra.mxu0 %v2129_v4  ;;  %1936 = vmatprep.subr.bf16.mxu1 %v2275_v1 }
   0x9   :  { %1944 = vmatprep.subr.bf16.mxu0 %v2275_v1 }
   0xa   :  { %1933 = vmatmul.mubr.bf16.vlgmr.msra.gmra.mrb[0].mxu1 %v2277_v3 }
   0xb   :  { %1921 = vmatmul.mubr.msk.bf16.vlgmr.msra.gmra.mrb[0].mxu0 %vm104_vm1, %v2132_v7  ;;  %1940 = vmatprep.mubr.msk.bf16.mxu1 %vm2276_vm0, %v2275_v1 }
   0xc   :  { %1924 = vmatprep.mubr.msk.bf16.mxu0 %vm104_vm1, %v2135_v29  ;;  %1937 = vmatpush3.bf16.msra.mxu1 %v2398_v31 }
   0xd   :  { %1945 = vmatpush3.bf16.msra.mxu0 %v2403_v32  ;;  %1938 = vmatprep.subr.bf16.mxu1 %v2275_v1 }
   0xe   :  { %1946 = vmatprep.subr.bf16.mxu0 %v2275_v1 }
  0x10   :  { %1939 = vmatpush3.bf16.msra.mxu1 %v2410_v33 }
  0x11   :  { %1947 = vmatpush3.bf16.msra.mxu0 %v2418_v34  ;;  %1952 = vmatprep.subr.bf16.mxu1 %v2275_v1 }
  0x12   :  { %1960 = vmatprep.subr.bf16.mxu0 %v2275_v1 }
  0x13   :  { %1925 = vmatmul.mubr.msk.bf16.gmra.mrb[4].mxu0 %vm104_vm1, %v2137_v30  ;;  %1941 = vmatmul.mubr.bf16.vlgmr.msra.gmra.mrb[4].mxu1 %v2277_v3 }
  0x14   :  { %1948 = vmatprep.mubr.msk.bf16.mxu0 %vm2276_vm0, %v2275_v1  ;;  %1953 = vmatpush3.bf16.msra.mxu1 %v2344_v2 }
  0x15   :  { %1956 = vmatprep.mubr.msk.bf16.mxu1 %vm2276_vm0, %v2275_v1  ;;  %1954 = vmatprep.subr.bf16.mxu1 %v2275_v1 }
  0x18   :  { %1955 = vmatpush3.bf16.msra.mxu1 %v2355_v5 }
  0x19   :  { %1968 = vmatprep.subr.bf16.mxu1 %v2275_v1 }
  0xdd   :  { %v231_v10 = vpop.f32.mrb[0].mxu1 }
  0xde   :  { %v2377_v9 = vpop.f32.mrb[0].mxu0  ;;  %v1934_v12 = vpop.f32.mrb[1].mxu1 }
  0xdf   :  { %v151_v11 = vpop.f32.mrb[1].mxu0  ;;  %v234_v15 = vpop.f32.mrb[2].mxu1 }
  0xe0   :  { %v152_v13 = vadd.f32 %v2375_v8, %v151_v11  ;;  %v2380_v14 = vpop.f32.mrb[2].mxu0  ;;  %v1935_v17 = vpop.f32.mrb[3].mxu1 }
  0xe1   :  { %v2382_v16 = vpop.f32.mrb[3].mxu0 }
  0xe2   :  { %v289_v18 = vadd.f32 %v231_v10, %v152_v13  ;;  %v155_v48 = vadd.f32 %v2375_v8, %v2382_v16 }
  0xe4   :  { %2139 = vtanh.f32 %v289_v18  ;;  %v1795_v20 = vmul.f32 -1.442695, %v289_v18 }
  0xe6   :  { %2141 = vpow2.f32 %v1795_v20  ;;  %v2436_v39 = vpop.f32.mrb[4].mxu0  ;;  %v283_v43 = vpop.f32.mrb[4].mxu1 }
  0xe7   :  { %v2438_v40 = vpop.f32.mrb[5].mxu0  ;;  %v1942_v44 = vpop.f32.mrb[5].mxu1 }
  0xe8   :  { %v2440_v41 = vpop.f32.mrb[6].mxu0  ;;  %v286_v45 = vpop.f32.mrb[6].mxu1 }
  0xe9   :  { %v2442_v42 = vpop.f32.mrb[7].mxu0  ;;  %v1943_v46 = vpop.f32.mrb[7].mxu1 }
  0xee   :  { %v2140_v19 = vpop.eup %2139 }
  0xef   :  { %299 = vrot.lane.b32.xlu0 %v2140_v19, %s2278_s26 }
  0xf0   :  { %v2142_v21 = vpop.eup %2141 }
  0xf1   :  { %v293_v22 = vadd.f32 1.0, %v2142_v21 }
  0xf3   :  { %2143 = vrcp.f32 %v293_v22 }
  0xfd   :  { %v2144_v23 = vpop.eup %2143 }
  0xfe   :  { %v297_v26 = vmul.f32 0.0, %v2144_v23 }
 0x161   :  { %v300_v24 = vpop.permute.xlu0 %299 }
 0x162   :  { %v302_v25 = vmul.f32 %v2144_v23, %v300_v24 }
 0x164   :  { %304 = vrot.lane.b32.xlu0 %v302_v25, %s2278_s26 }
 0x1d6   :  { %v305_v27 = vpop.permute.xlu0 %304 }
 0x1d7   :  { %v2386_v28 = vadd.f32 %v305_v27, %v297_v26 }
 0x1d9   :  { %2145 = vtanh.f32 %v2386_v28 }
 0x1e3   :  { %v2146_v35 = vpop.eup %2145 }
 0x1e4   :  { %310 = vrot.lane.b32.xlu1 %v2146_v35, %s2278_s26 }
 0x256   :  { %v311_v36 = vpop.permute.xlu1 %310 }
 0x257   :  { %v313_v37 = vmul.f32 %v2144_v23, %v311_v36 }
 0x259   :  { %v314_v38 = vpack.c.bf16 %v313_v37, %v313_v37 }
 0x25b   :  { %316 = vrot.lane.b32.xlu1 %v314_v38, %s2279_s18 }
 0x2cd   :  { %v317_v47 = vpop.permute.xlu1 %316 }
 0x2ce   :  { %1949 = vmatmul.mubr.msk.bf16.vlgmr.msra.gmra.mrb[8].mxu0 %vm104_vm1, %v317_v47  ;;  %1957 = vmatmul.mubr.msk.bf16.vlgmr.msra.gmra.mrb[8].mxu1 %vm104_vm1, %v317_v47 }
 0x2cf   :  { %1969 = vmatpush3.bf16.msra.mxu1 %v2403_v32  ;;  %1961 = vmatpush3.bf16.msra.mxu0 %v2398_v31 }
 0x2d0   :  { %1970 = vmatprep.subr.bf16.mxu1 %v2275_v1  ;;  %1962 = vmatprep.subr.bf16.mxu0 %v2275_v1 }
 0x2d1   :  { %1972 = vmatprep.mubr.msk.bf16.mxu1 %vm2276_vm0, %v2275_v1  ;;  %1964 = vmatprep.mubr.msk.bf16.mxu0 %vm2276_vm0, %v2275_v1 }
 0x2d3   :  { %1971 = vmatpush3.bf16.msra.mxu1 %v2418_v34  ;;  %1963 = vmatpush3.bf16.msra.mxu0 %v2410_v33 }
 0x2d4   :  { %1976 = vmatprep.subr.bf16.mxu0 %v2275_v1  ;;  %1984 = vmatprep.subr.bf16.mxu1 %v2275_v1 }
 0x3a1   :  { %v367_v50 = vpop.f32.mrb[8].mxu0  ;;  %v446_v51 = vpop.f32.mrb[8].mxu1 }
 0x3a2   :  { %v368_v52 = vadd.f32 %v367_v50, %v283_v43  ;;  %v498_v53 = vadd.f32 %v446_v51, %v155_v48  ;;  %v1950_v54 = vpop.f32.mrb[9].mxu0  ;;  %v1958_v55 = vpop.f32.mrb[9].mxu1 }
 0x3a3   :  { %v370_v56 = vpop.f32.mrb[10].mxu0  ;;  %v449_v57 = vpop.f32.mrb[10].mxu1 }
 0x3a4   :  { %v379_v58 = vadd.f32 %v2463_v49, %v368_v52  ;;  %2147 = vtanh.f32 %v498_v53  ;;  %v1951_v59 = vpop.f32.mrb[11].mxu0  ;;  %v1959_v60 = vpop.f32.mrb[11].mxu1  ;;  %v1803_v63 = vmul.f32 -1.442695, %v498_v53  ;;  %v160_v53 = vadd.f32 %v2377_v9, %v2375_v8 }
 0x3a6   :  { %2149 = vtanh.f32 %v379_v58  ;;  %v1800_v0 = vmul.f32 -1.442695, %v379_v58 }
 0x3a7   :  { %2151 = vpow2.f32 %v1803_v63 }
 0x3a8   :  { %2153 = vpow2.f32 %v1800_v0 }
 0x3ae   :  { %v2148_v61 = vpop.eup %2147 }
 0x3af   :  { %508 = vrot.lane.b32.xlu1 %v2148_v61, %s2278_s26 }
 0x3b0   :  { %v2150_v62 = vpop.eup %2149 }
 0x3b1   :  { %389 = vrot.lane.b32.xlu0 %v2150_v62, %s2278_s26  ;;  %v2152_v4 = vpop.eup %2151 }
 0x3b2   :  { %v2154_v6 = vpop.eup %2153  ;;  %v502_v7 = vadd.f32 1.0, %v2152_v4 }
 0x3b3   :  { %v383_v10 = vadd.f32 1.0, %v2154_v6 }
 0x3b4   :  { %2155 = vrcp.f32 %v502_v7 }
 0x3b5   :  { %2157 = vrcp.f32 %v383_v10 }
 0x3be   :  { %v2156_v11 = vpop.eup %2155 }
 0x3bf   :  { %v2158_v15 = vpop.eup %2157  ;;  %v506_v18 = vmul.f32 %v2156_v11, %v2386_v28 }
 0x3c0   :  { %v387_v21 = vmul.f32 0.0, %v2158_v15 }
 0x421   :  { %v509_v12 = vpop.permute.xlu1 %508 }
 0x422   :  { %v511_v13 = vmul.f32 %v2156_v11, %v509_v12 }
 0x423   :  { %v390_v16 = vpop.permute.xlu0 %389 }
 0x424   :  { %v392_v17 = vmul.f32 %v2158_v15, %v390_v16  ;;  %513 = vrot.lane.b32.xlu1 %v511_v13, %s2278_s26 }
 0x426   :  { %394 = vrot.lane.b32.xlu0 %v392_v17, %s2278_s26 }
 0x496   :  { %v514_v19 = vpop.permute.xlu1 %513 }
 0x497   :  { %v2471_v20 = vadd.f32 %v514_v19, %v506_v18 }
 0x498   :  { %v395_v22 = vpop.permute.xlu0 %394 }
 0x499   :  { %2159 = vtanh.f32 %v2471_v20  ;;  %v2474_v23 = vadd.f32 %v395_v22, %v387_v21 }
 0x49b   :  { %2161 = vtanh.f32 %v2474_v23 }
 0x4a3   :  { %v2160_v24 = vpop.eup %2159 }
 0x4a4   :  { %519 = vrot.lane.b32.xlu1 %v2160_v24, %s2278_s26 }
 0x4a5   :  { %v2162_v25 = vpop.eup %2161 }
 0x4a6   :  { %400 = vrot.lane.b32.xlu0 %v2162_v25, %s2278_s26 }
 0x516   :  { %v520_v26 = vpop.permute.xlu1 %519 }
 0x517   :  { %v522_v27 = vmul.f32 %v2156_v11, %v520_v26 }
 0x518   :  { %v401_v28 = vpop.permute.xlu0 %400 }
 0x519   :  { %v523_v29 = vpack.c.bf16 %v522_v27, %v522_v27  ;;  %v2479_v30 = vmul.f32 %v2158_v15, %v401_v28 }
 0x51b   :  { %v404_v35 = vpack.c.bf16 %v2479_v30, %v2479_v30  ;;  %525 = vrot.lane.b32.xlu1 %v523_v29, %s2279_s18 }
 0x51d   :  { %453 = vrot.lane.b32.xlu0 %v404_v35, %s2279_s18 }
 0x58d   :  { %v526_v36 = vpop.permute.xlu1 %525 }
 0x58e   :  { %1973 = vmatmul.mubr.msk.bf16.vlgmr.msra.gmra.mrb[12].mxu1 %vm104_vm1, %v526_v36 }
 0x58f   :  { %v454_v37 = vpop.permute.xlu0 %453  ;;  %1985 = vmatpush3.bf16.msra.mxu1 %v2398_v31  ;;  %1988 = vmatprep.mubr.msk.bf16.mxu1 %vm2276_vm0, %v2275_v1 }
 0x590   :  { %1965 = vmatmul.mubr.msk.bf16.vlgmr.msra.gmra.mrb[12].mxu0 %vm104_vm1, %v454_v37  ;;  %1986 = vmatprep.subr.bf16.mxu1 %v2275_v1 }
 0x591   :  { %1977 = vmatpush3.bf16.msra.mxu0 %v2344_v2  ;;  %1980 = vmatprep.mubr.msk.bf16.mxu0 %vm2276_vm0, %v2275_v1 }
 0x592   :  { %1978 = vmatprep.subr.bf16.mxu0 %v2275_v1 }
 0x593   :  { %1987 = vmatpush3.bf16.msra.mxu1 %v2410_v33 }
 0x594   :  { %2000 = vmatprep.subr.bf16.mxu1 %v2275_v1 }
 0x595   :  { %1979 = vmatpush3.bf16.msra.mxu0 %v2355_v5 }
 0x596   :  { %1992 = vmatprep.subr.bf16.mxu0 %v2275_v1 }
 0x598   :  { %1981 = vmatmul.mubr.msk.bf16.vlgmr.msra.gmra.mrb[16].mxu0 %vm104_vm1, %v526_v36 }
 0x599   :  { %1993 = vmatpush3.bf16.msra.mxu0 %v2403_v32  ;;  %1996 = vmatprep.mubr.msk.bf16.mxu0 %vm2276_vm0, %v2275_v1 }
 0x59a   :  { %1994 = vmatprep.subr.bf16.mxu0 %v2275_v1 }
 0x59d   :  { %1995 = vmatpush3.bf16.msra.mxu0 %v2418_v34 }
 0x59e   :  { %2008 = vmatprep.subr.bf16.mxu0 %v2275_v1 }
 0x661   :  { %v564_v38 = vpop.f32.mrb[12].mxu1 }
 0x662   :  { %v1974_v43 = vpop.f32.mrb[13].mxu1 }
 0x663   :  { %v492_v44 = vpop.f32.mrb[12].mxu0  ;;  %v567_v45 = vpop.f32.mrb[14].mxu1 }
 0x664   :  { %v565_v46 = vadd.f32 %v564_v38, %v492_v44  ;;  %v1966_v47 = vpop.f32.mrb[13].mxu0  ;;  %v1975_v48 = vpop.f32.mrb[15].mxu1  ;;  %v163_v45 = vadd.f32 %v2380_v14, %v2375_v8 }
 0x665   :  { %v495_v50 = vpop.f32.mrb[14].mxu0 }
 0x666   :  { %v570_v51 = vadd.f32 %v2463_v49, %v565_v46  ;;  %v1967_v52 = vpop.f32.mrb[15].mxu0 }
 0x668   :  { %2163 = vtanh.f32 %v570_v51  ;;  %v1805_v61 = vmul.f32 -1.442695, %v570_v51 }
 0x66b   :  { %v637_v54 = vpop.f32.mrb[16].mxu0 }
 0x66c   :  { %v689_v55 = vadd.f32 %v637_v54, %v160_v53  ;;  %v1982_v56 = vpop.f32.mrb[17].mxu0 }
 0x66d   :  { %v640_v57 = vpop.f32.mrb[18].mxu0 }
 0x66e   :  { %2165 = vtanh.f32 %v689_v55  ;;  %v1983_v58 = vpop.f32.mrb[19].mxu0  ;;  %v1808_v62 = vmul.f32 -1.442695, %v689_v55 }
 0x66f   :  { %2167 = vpow2.f32 %v1805_v61 }
 0x670   :  { %2169 = vpow2.f32 %v1808_v62 }
 0x672   :  { %v2164_v59 = vpop.eup %2163 }
 0x673   :  { %580 = vrot.lane.b32.xlu0 %v2164_v59, %s2278_s26 }
 0x678   :  { %v2166_v60 = vpop.eup %2165 }
 0x679   :  { %699 = vrot.lane.b32.xlu1 %v2166_v60, %s2278_s26  ;;  %v2168_v63 = vpop.eup %2167 }
 0x67a   :  { %v574_v0 = vadd.f32 1.0, %v2168_v63  ;;  %v2170_v4 = vpop.eup %2169 }
 0x67b   :  { %v693_v9 = vadd.f32 1.0, %v2170_v4 }
 0x67c   :  { %2171 = vrcp.f32 %v574_v0 }
 0x67d   :  { %2173 = vrcp.f32 %v693_v9 }
 0x686   :  { %v2172_v6 = vpop.eup %2171 }
 0x687   :  { %v2174_v11 = vpop.eup %2173  ;;  %v578_v15 = vmul.f32 %v2172_v6, %v2474_v23 }
 0x688   :  { %v697_v18 = vmul.f32 %v2174_v11, %v2471_v20 }
 0x6e5   :  { %v581_v7 = vpop.permute.xlu0 %580 }
 0x6e6   :  { %v583_v10 = vmul.f32 %v2172_v6, %v581_v7 }
 0x6e8   :  { %585 = vrot.lane.b32.xlu0 %v583_v10, %s2278_s26 }
 0x6eb   :  { %v700_v12 = vpop.permute.xlu1 %699 }
 0x6ec   :  { %v702_v13 = vmul.f32 %v2174_v11, %v700_v12 }
 0x6ee   :  { %704 = vrot.lane.b32.xlu1 %v702_v13, %s2278_s26 }
 0x75a   :  { %v586_v16 = vpop.permute.xlu0 %585 }
 0x75b   :  { %v2514_v17 = vadd.f32 %v586_v16, %v578_v15 }
 0x75d   :  { %2175 = vtanh.f32 %v2514_v17 }
 0x760   :  { %v705_v19 = vpop.permute.xlu1 %704 }
 0x761   :  { %v2518_v21 = vadd.f32 %v705_v19, %v697_v18 }
 0x763   :  { %2177 = vtanh.f32 %v2518_v21 }
 0x767   :  { %v2176_v22 = vpop.eup %2175 }
 0x768   :  { %591 = vrot.lane.b32.xlu0 %v2176_v22, %s2278_s26 }
 0x76d   :  { %v2178_v24 = vpop.eup %2177 }
 0x76e   :  { %710 = vrot.lane.b32.xlu1 %v2178_v24, %s2278_s26 }
 0x7da   :  { %v592_v25 = vpop.permute.xlu0 %591 }
 0x7db   :  { %v2523_v23 = vmul.f32 %v2172_v6, %v592_v25 }
 0x7dd   :  { %v595_v26 = vpack.c.bf16 %v2523_v23, %v2523_v23 }
 0x7df   :  { %644 = vrot.lane.b32.xlu0 %v595_v26, %s2279_s18 }
 0x7e0   :  { %v711_v20 = vpop.permute.xlu1 %710 }
 0x7e1   :  { %v713_v27 = vmul.f32 %v2174_v11, %v711_v20 }
 0x7e3   :  { %v714_v28 = vpack.c.bf16 %v713_v27, %v713_v27 }
 0x7e5   :  { %716 = vrot.lane.b32.xlu1 %v714_v28, %s2279_s18 }
 0x851   :  { %v645_v29 = vpop.permute.xlu0 %644 }
 0x852   :  { %1989 = vmatmul.mubr.msk.bf16.vlgmr.msra.gmra.mrb[16].mxu1 %vm104_vm1, %v645_v29 }
 0x853   :  { %2001 = vmatpush3.bf16.msra.mxu1 %v2344_v2  ;;  %2004 = vmatprep.mubr.msk.bf16.mxu1 %vm2276_vm0, %v2275_v1 }
 0x854   :  { %2002 = vmatprep.subr.bf16.mxu1 %v2275_v1 }
 0x857   :  { %2003 = vmatpush3.bf16.msra.mxu1 %v2355_v5  ;;  %v717_v35 = vpop.permute.xlu1 %716 }
 0x858   :  { %1997 = vmatmul.mubr.msk.bf16.vlgmr.msra.gmra.mrb[20].mxu0 %vm104_vm1, %v717_v35  ;;  %2016 = vmatprep.subr.bf16.mxu1 %v2275_v1 }
 0x859   :  { %2009 = vmatpush3.bf16.msra.mxu0 %v2398_v31  ;;  %2012 = vmatprep.mubr.msk.bf16.mxu0 %vm2276_vm0, %v2275_v1 }
 0x85a   :  { %2005 = vmatmul.mubr.msk.bf16.vlgmr.msra.gmra.mrb[20].mxu1 %vm104_vm1, %v717_v35  ;;  %2010 = vmatprep.subr.bf16.mxu0 %v2275_v1 }
 0x85b   :  { %2017 = vmatpush3.bf16.msra.mxu1 %v2403_v32  ;;  %2020 = vmatprep.mubr.msk.bf16.mxu1 %vm2276_vm0, %v2275_v1 }
 0x85c   :  { %2018 = vmatprep.subr.bf16.mxu1 %v2275_v1 }
 0x85d   :  { %2011 = vmatpush3.bf16.msra.mxu0 %v2410_v33 }
 0x85e   :  { %2024 = vmatprep.subr.bf16.mxu0 %v2275_v1 }
 0x85f   :  { %2019 = vmatpush3.bf16.msra.mxu1 %v2418_v34 }
 0x860   :  { %2032 = vmatprep.subr.bf16.mxu1 %v2275_v1 }
 0x925   :  { %v683_v36 = vpop.f32.mrb[16].mxu1 }
 0x926   :  { %v1990_v37 = vpop.f32.mrb[17].mxu1 }
 0x927   :  { %v686_v38 = vpop.f32.mrb[18].mxu1 }
 0x928   :  { %v1991_v43 = vpop.f32.mrb[19].mxu1 }
 0x92b   :  { %v755_v44 = vpop.f32.mrb[20].mxu0 }
 0x92c   :  { %v756_v46 = vadd.f32 %v755_v44, %v683_v36  ;;  %v1998_v47 = vpop.f32.mrb[21].mxu0 }
 0x92d   :  { %v758_v48 = vpop.f32.mrb[22].mxu0  ;;  %v828_v50 = vpop.f32.mrb[20].mxu1 }
 0x92e   :  { %v761_v51 = vadd.f32 %v2463_v49, %v756_v46  ;;  %v880_v52 = vadd.f32 %v828_v50, %v163_v45  ;;  %v1999_v53 = vpop.f32.mrb[23].mxu0  ;;  %v2006_v54 = vpop.f32.mrb[21].mxu1  ;;  %v168_v48 = vadd.f32 %v2375_v8, %v2438_v40 }
 0x92f   :  { %v831_v55 = vpop.f32.mrb[22].mxu1 }
 0x930   :  { %2179 = vtanh.f32 %v761_v51  ;;  %v2007_v56 = vpop.f32.mrb[23].mxu1  ;;  %v1810_v14 = vmul.f32 -1.442695, %v761_v51  ;;  %v1813_v59 = vmul.f32 -1.442695, %v880_v52 }
 0x931   :  { %2181 = vtanh.f32 %v880_v52 }
 0x932   :  { %2183 = vpow2.f32 %v1810_v14 }
 0x933   :  { %2185 = vpow2.f32 %v1813_v59 }
 0x93a   :  { %v2180_v57 = vpop.eup %2179 }
 0x93b   :  { %v2182_v58 = vpop.eup %2181  ;;  %771 = vrot.lane.b32.xlu0 %v2180_v57, %s2278_s26 }
 0x93c   :  { %890 = vrot.lane.b32.xlu1 %v2182_v58, %s2278_s26  ;;  %v2184_v60 = vpop.eup %2183 }
 0x93d   :  { %v2186_v61 = vpop.eup %2185  ;;  %v765_v62 = vadd.f32 1.0, %v2184_v60 }
 0x93e   :  { %v884_v63 = vadd.f32 1.0, %v2186_v61 }
 0x93f   :  { %2187 = vrcp.f32 %v765_v62 }
 0x940   :  { %2189 = vrcp.f32 %v884_v63 }
 0x949   :  { %v2188_v0 = vpop.eup %2187 }
 0x94a   :  { %v2190_v9 = vpop.eup %2189  ;;  %v769_v11 = vmul.f32 %v2188_v0, %v2514_v17 }
 0x94b   :  { %v888_v12 = vmul.f32 %v2190_v9, %v2518_v21 }
 0x9ad   :  { %v772_v4 = vpop.permute.xlu0 %771 }
 0x9ae   :  { %v891_v6 = vpop.permute.xlu1 %890  ;;  %v774_v7 = vmul.f32 %v2188_v0, %v772_v4 }
 0x9af   :  { %v893_v10 = vmul.f32 %v2190_v9, %v891_v6 }
 0x9b0   :  { %776 = vrot.lane.b32.xlu0 %v774_v7, %s2278_s26 }
 0x9b1   :  { %895 = vrot.lane.b32.xlu1 %v893_v10, %s2278_s26 }
 0xa22   :  { %v777_v13 = vpop.permute.xlu0 %776 }
 0xa23   :  { %v896_v15 = vpop.permute.xlu1 %895  ;;  %v2559_v16 = vadd.f32 %v777_v13, %v769_v11 }
 0xa24   :  { %v2561_v18 = vadd.f32 %v896_v15, %v888_v12 }
 0xa25   :  { %2191 = vtanh.f32 %v2559_v16 }
 0xa26   :  { %2193 = vtanh.f32 %v2561_v18 }
 0xa2f   :  { %v2192_v19 = vpop.eup %2191 }
 0xa30   :  { %v2194_v22 = vpop.eup %2193  ;;  %782 = vrot.lane.b32.xlu0 %v2192_v19, %s2278_s26 }
 0xa31   :  { %901 = vrot.lane.b32.xlu1 %v2194_v22, %s2278_s26 }
 0xaa2   :  { %v783_v24 = vpop.permute.xlu0 %782 }
 0xaa3   :  { %v902_v17 = vpop.permute.xlu1 %901  ;;  %v2567_v25 = vmul.f32 %v2188_v0, %v783_v24 }
 0xaa4   :  { %v904_v21 = vmul.f32 %v2190_v9, %v902_v17 }
 0xaa5   :  { %v786_v26 = vpack.c.bf16 %v2567_v25, %v2567_v25 }
 0xaa6   :  { %v905_v20 = vpack.c.bf16 %v904_v21, %v904_v21 }
 0xaa7   :  { %835 = vrot.lane.b32.xlu0 %v786_v26, %s2279_s18 }
 0xaa8   :  { %907 = vrot.lane.b32.xlu1 %v905_v20, %s2279_s18 }
 0xb19   :  { %v836_v27 = vpop.permute.xlu0 %835 }
 0xb1a   :  { %v908_v28 = vpop.permute.xlu1 %907  ;;  %2013 = vmatmul.mubr.msk.bf16.vlgmr.msra.gmra.mrb[24].mxu0 %vm104_vm1, %v836_v27 }
 0xb1b   :  { %2021 = vmatmul.mubr.msk.bf16.vlgmr.msra.gmra.mrb[24].mxu1 %vm104_vm1, %v908_v28  ;;  %2025 = vmatpush3.bf16.msra.mxu0 %v2344_v2 }
 0xb1c   :  { %2026 = vmatprep.subr.bf16.mxu0 %v2275_v1  ;;  %2028 = vmatprep.mubr.msk.bf16.mxu0 %vm2276_vm0, %v2275_v1 }
 0xb1d   :  { %2033 = vmatpush3.bf16.msra.mxu1 %v2398_v31  ;;  %2036 = vmatprep.mubr.msk.bf16.mxu1 %vm2276_vm0, %v2275_v1 }
 0xb1e   :  { %2034 = vmatprep.subr.bf16.mxu1 %v2275_v1 }
 0xb1f   :  { %2027 = vmatpush3.bf16.msra.mxu0 %v2355_v5 }
 0xb20   :  { %2040 = vmatprep.subr.bf16.mxu0 %v2275_v1 }
 0xb21   :  { %2035 = vmatpush3.bf16.msra.mxu1 %v2410_v33 }
 0xb22   :  { %2029 = vmatmul.mubr.msk.bf16.vlgmr.msra.gmra.mrb[28].mxu0 %vm104_vm1, %v908_v28  ;;  %2048 = vmatprep.subr.bf16.mxu1 %v2275_v1 }
 0xb23   :  { %2041 = vmatpush3.bf16.msra.mxu0 %v2403_v32  ;;  %2044 = vmatprep.mubr.msk.bf16.mxu0 %vm2276_vm0, %v2275_v1 }
 0xb24   :  { %2042 = vmatprep.subr.bf16.mxu0 %v2275_v1 }
 0xb27   :  { %2043 = vmatpush3.bf16.msra.mxu0 %v2418_v34 }
 0xb28   :  { %2056 = vmatprep.subr.bf16.mxu0 %v2275_v1 }
 0xbed   :  { %v874_v29 = vpop.f32.mrb[24].mxu0 }
 0xbee   :  { %v946_v35 = vpop.f32.mrb[24].mxu1  ;;  %v2014_v36 = vpop.f32.mrb[25].mxu0 }
 0xbef   :  { %v947_v37 = vadd.f32 %v946_v35, %v874_v29  ;;  %v2022_v38 = vpop.f32.mrb[25].mxu1  ;;  %v877_v43 = vpop.f32.mrb[26].mxu0 }
 0xbf0   :  { %v949_v44 = vpop.f32.mrb[26].mxu1  ;;  %v2015_v45 = vpop.f32.mrb[27].mxu0  ;;  %v171_v43 = vadd.f32 %v2375_v8, %v2442_v42 }
 0xbf1   :  { %v952_v46 = vadd.f32 %v2463_v49, %v947_v37  ;;  %v2023_v47 = vpop.f32.mrb[27].mxu1 }
 0xbf3   :  { %2195 = vtanh.f32 %v952_v46  ;;  %v1815_v57 = vmul.f32 -1.442695, %v952_v46 }
 0xbf5   :  { %v1019_v50 = vpop.f32.mrb[28].mxu0 }
 0xbf6   :  { %v1071_v51 = vadd.f32 %v1019_v50, %v168_v48  ;;  %v2030_v52 = vpop.f32.mrb[29].mxu0 }
 0xbf7   :  { %v1022_v53 = vpop.f32.mrb[30].mxu0 }
 0xbf8   :  { %2197 = vtanh.f32 %v1071_v51  ;;  %v2031_v54 = vpop.f32.mrb[31].mxu0  ;;  %v1818_v58 = vmul.f32 -1.442695, %v1071_v51 }
 0xbf9   :  { %2199 = vpow2.f32 %v1815_v57 }
 0xbfa   :  { %2201 = vpow2.f32 %v1818_v58 }
 0xbfd   :  { %v2196_v55 = vpop.eup %2195 }
 0xbfe   :  { %962 = vrot.lane.b32.xlu0 %v2196_v55, %s2278_s26 }
 0xc02   :  { %v2198_v56 = vpop.eup %2197 }
 0xc03   :  { %1081 = vrot.lane.b32.xlu1 %v2198_v56, %s2278_s26  ;;  %v2200_v14 = vpop.eup %2199 }
 0xc04   :  { %v956_v59 = vadd.f32 1.0, %v2200_v14  ;;  %v2202_v60 = vpop.eup %2201 }
 0xc05   :  { %v1075_v40 = vadd.f32 1.0, %v2202_v60 }
 0xc06   :  { %2203 = vrcp.f32 %v956_v59 }
 0xc07   :  { %2205 = vrcp.f32 %v1075_v40 }
 0xc10   :  { %v2204_v61 = vpop.eup %2203 }
 0xc11   :  { %v2206_v0 = vpop.eup %2205  ;;  %v960_v6 = vmul.f32 %v2204_v61, %v2559_v16 }
 0xc12   :  { %v1079_v11 = vmul.f32 %v2206_v0, %v2561_v18 }
 0xc70   :  { %v963_v62 = vpop.permute.xlu0 %962 }
 0xc71   :  { %v965_v63 = vmul.f32 %v2204_v61, %v963_v62 }
 0xc73   :  { %967 = vrot.lane.b32.xlu0 %v965_v63, %s2278_s26 }
 0xc75   :  { %v1082_v4 = vpop.permute.xlu1 %1081 }
 0xc76   :  { %v1084_v9 = vmul.f32 %v2206_v0, %v1082_v4 }
 0xc78   :  { %1086 = vrot.lane.b32.xlu1 %v1084_v9, %s2278_s26 }
 0xce5   :  { %v968_v7 = vpop.permute.xlu0 %967 }
 0xce6   :  { %v2602_v10 = vadd.f32 %v968_v7, %v960_v6 }
 0xce8   :  { %2207 = vtanh.f32 %v2602_v10 }
 0xcea   :  { %v1087_v12 = vpop.permute.xlu1 %1086 }
 0xceb   :  { %v2606_v13 = vadd.f32 %v1087_v12, %v1079_v11 }
 0xced   :  { %2209 = vtanh.f32 %v2606_v13 }
 0xcf2   :  { %v2208_v15 = vpop.eup %2207 }
 0xcf3   :  { %973 = vrot.lane.b32.xlu0 %v2208_v15, %s2278_s26 }
 0xcf7   :  { %v2210_v19 = vpop.eup %2209 }
 0xcf8   :  { %1092 = vrot.lane.b32.xlu1 %v2210_v19, %s2278_s26 }
 0xd65   :  { %v974_v22 = vpop.permute.xlu0 %973 }
 0xd66   :  { %v2611_v16 = vmul.f32 %v2204_v61, %v974_v22 }
 0xd68   :  { %v977_v24 = vpack.c.bf16 %v2611_v16, %v2611_v16 }
 0xd6a   :  { %1026 = vrot.lane.b32.xlu0 %v977_v24, %s2279_s18  ;;  %v1093_v18 = vpop.permute.xlu1 %1092 }
 0xd6b   :  { %v1095_v17 = vmul.f32 %v2206_v0, %v1093_v18 }
 0xd6d   :  { %v1096_v21 = vpack.c.bf16 %v1095_v17, %v1095_v17 }
 0xd6f   :  { %1098 = vrot.lane.b32.xlu1 %v1096_v21, %s2279_s18 }
 0xddc   :  { %v1027_v26 = vpop.permute.xlu0 %1026 }
 0xddd   :  { %2037 = vmatmul.mubr.msk.bf16.vlgmr.msra.gmra.mrb[28].mxu1 %vm104_vm1, %v1027_v26 }
 0xdde   :  { %2049 = vmatpush3.bf16.msra.mxu1 %v2344_v2  ;;  %2052 = vmatprep.mubr.msk.bf16.mxu1 %vm2276_vm0, %v2275_v1 }
 0xddf   :  { %2050 = vmatprep.subr.bf16.mxu1 %v2275_v1 }
 0xde1   :  { %v1099_v20 = vpop.permute.xlu1 %1098 }
 0xde2   :  { %2051 = vmatpush3.bf16.msra.mxu1 %v2355_v5  ;;  %2045 = vmatmul.mubr.msk.bf16.vlgmr.msra.gmra.mrb[32].mxu0 %vm104_vm1, %v1099_v20 }
 0xde3   :  { %2064 = vmatprep.subr.bf16.mxu1 %v2275_v1  ;;  %2057 = vmatpush3.bf16.msra.mxu0 %v2398_v31 }
 0xde4   :  { %2058 = vmatprep.subr.bf16.mxu0 %v2275_v1  ;;  %2060 = vmatprep.mubr.msk.bf16.mxu0 %vm2276_vm0, %v2275_v1 }
 0xde5   :  { %2053 = vmatmul.mubr.msk.bf16.vlgmr.msra.gmra.mrb[32].mxu1 %vm104_vm1, %v1099_v20 }
 0xde6   :  { %2065 = vmatpush3.bf16.msra.mxu1 %v2403_v32  ;;  %2068 = vmatprep.mubr.msk.bf16.mxu1 %vm2276_vm0, %v2275_v1 }
 0xde7   :  { %2066 = vmatprep.subr.bf16.mxu1 %v2275_v1  ;;  %2059 = vmatpush3.bf16.msra.mxu0 %v2410_v33 }
 0xde8   :  { %2072 = vmatprep.subr.bf16.mxu0 %v2275_v1 }
 0xdea   :  { %2067 = vmatpush3.bf16.msra.mxu1 %v2418_v34 }
 0xdeb   :  { %2080 = vmatprep.subr.bf16.mxu1 %v2275_v1 }
 0xeb0   :  { %v1065_v27 = vpop.f32.mrb[28].mxu1 }
 0xeb1   :  { %v2038_v28 = vpop.f32.mrb[29].mxu1 }
 0xeb2   :  { %v1068_v29 = vpop.f32.mrb[30].mxu1 }
 0xeb3   :  { %v2039_v35 = vpop.f32.mrb[31].mxu1 }
 0xeb4   :  { %v176_v35 = vadd.f32 %v2436_v39, %v2375_v8 }
 0xeb5   :  { %v1137_v36 = vpop.f32.mrb[32].mxu0 }
 0xeb6   :  { %v1138_v37 = vadd.f32 %v1137_v36, %v1065_v27  ;;  %v2046_v38 = vpop.f32.mrb[33].mxu0 }
 0xeb7   :  { %v1140_v44 = vpop.f32.mrb[34].mxu0 }
 0xeb8   :  { %v1143_v45 = vadd.f32 %v2463_v49, %v1138_v37  ;;  %v1210_v46 = vpop.f32.mrb[32].mxu1  ;;  %v2047_v47 = vpop.f32.mrb[35].mxu0 }
 0xeb9   :  { %v1262_v48 = vadd.f32 %v1210_v46, %v171_v43  ;;  %v2054_v50 = vpop.f32.mrb[33].mxu1 }
 0xeba   :  { %2211 = vtanh.f32 %v1143_v45  ;;  %v1213_v51 = vpop.f32.mrb[34].mxu1  ;;  %v1820_v55 = vmul.f32 -1.442695, %v1143_v45 }
 0xebb   :  { %2213 = vtanh.f32 %v1262_v48  ;;  %v2055_v52 = vpop.f32.mrb[35].mxu1  ;;  %v1823_v56 = vmul.f32 -1.442695, %v1262_v48 }
 0xebc   :  { %2215 = vpow2.f32 %v1820_v55 }
 0xebd   :  { %2217 = vpow2.f32 %v1823_v56 }
 0xec4   :  { %v2212_v53 = vpop.eup %2211 }
 0xec5   :  { %v2214_v54 = vpop.eup %2213  ;;  %1153 = vrot.lane.b32.xlu0 %v2212_v53, %s2278_s26 }
 0xec6   :  { %1272 = vrot.lane.b32.xlu1 %v2214_v54, %s2278_s26  ;;  %v2216_v42 = vpop.eup %2215 }
 0xec7   :  { %v2218_v57 = vpop.eup %2217  ;;  %v1147_v58 = vadd.f32 1.0, %v2216_v42 }
 0xec8   :  { %v1266_v14 = vadd.f32 1.0, %v2218_v57 }
 0xec9   :  { %2219 = vrcp.f32 %v1147_v58 }
 0xeca   :  { %2221 = vrcp.f32 %v1266_v14 }
 0xed3   :  { %v2220_v59 = vpop.eup %2219 }
 0xed4   :  { %v2222_v40 = vpop.eup %2221  ;;  %v1151_v0 = vmul.f32 %v2220_v59, %v2602_v10 }
 0xed5   :  { %v1270_v4 = vmul.f32 %v2222_v40, %v2606_v13 }
 0xf37   :  { %v1154_v60 = vpop.permute.xlu0 %1153 }
 0xf38   :  { %v1273_v61 = vpop.permute.xlu1 %1272  ;;  %v1156_v62 = vmul.f32 %v2220_v59, %v1154_v60 }
 0xf39   :  { %v1275_v63 = vmul.f32 %v2222_v40, %v1273_v61 }
 0xf3a   :  { %1158 = vrot.lane.b32.xlu0 %v1156_v62, %s2278_s26 }
 0xf3b   :  { %1277 = vrot.lane.b32.xlu1 %v1275_v63, %s2278_s26 }
 0xfac   :  { %v1159_v9 = vpop.permute.xlu0 %1158 }
 0xfad   :  { %v1278_v6 = vpop.permute.xlu1 %1277  ;;  %v2647_v7 = vadd.f32 %v1159_v9, %v1151_v0 }
 0xfae   :  { %v2649_v11 = vadd.f32 %v1278_v6, %v1270_v4 }
 0xfaf   :  { %2223 = vtanh.f32 %v2647_v7 }
 0xfb0   :  { %2225 = vtanh.f32 %v2649_v11 }
 0xfb9   :  { %v2224_v12 = vpop.eup %2223 }
 0xfba   :  { %v2226_v15 = vpop.eup %2225  ;;  %1164 = vrot.lane.b32.xlu0 %v2224_v12, %s2278_s26 }
 0xfbb   :  { %1283 = vrot.lane.b32.xlu1 %v2226_v15, %s2278_s26  ;;  %v2268_v15 = vld [vmem:[%s2798_s3 + $0x8] sm:$0xff]  }
0x102c   :  { %v1165_v19 = vpop.permute.xlu0 %1164 }
0x102d   :  { %v1284_v10 = vpop.permute.xlu1 %1283  ;;  %v2655_v22 = vmul.f32 %v2220_v59, %v1165_v19  ;;  %v2269_v19 = vld [vmem:[%s2801_s6] sm:$0xff]  }
0x102e   :  { %v1286_v13 = vmul.f32 %v2222_v40, %v1284_v10  ;;  %v2270_v10 = vld [vmem:[%s2802_s5] sm:$0xff]  }
0x102f   :  { %v1168_v24 = vpack.c.bf16 %v2655_v22, %v2655_v22 }
0x1030   :  { %v1287_v18 = vpack.c.bf16 %v1286_v13, %v1286_v13  ;;  %v2271_v13 = vld [vmem:[%s2801_s6 + $0x8] sm:$0xff]  }
0x1031   :  { %1217 = vrot.lane.b32.xlu0 %v1168_v24, %s2279_s18  ;;  %v2272_v24 = vld [vmem:[%s2802_s5 + $0x8] sm:$0xff]  }
0x1032   :  { %1289 = vrot.lane.b32.xlu1 %v1287_v18, %s2279_s18 }
0x10a3   :  { %v1218_v17 = vpop.permute.xlu0 %1217 }
0x10a4   :  { %v1290_v21 = vpop.permute.xlu1 %1289  ;;  %2061 = vmatmul.mubr.msk.bf16.vlgmr.msra.gmra.mrb[36].mxu0 %vm104_vm1, %v1218_v17 }
0x10a5   :  { %2069 = vmatmul.mubr.msk.bf16.vlgmr.msra.gmra.mrb[36].mxu1 %vm104_vm1, %v1290_v21  ;;  %2073 = vmatpush3.bf16.msra.mxu0 %v2344_v2 }
0x10a6   :  { %2074 = vmatprep.subr.bf16.mxu0 %v2275_v1  ;;  %2076 = vmatprep.mubr.msk.bf16.mxu0 %vm2276_vm0, %v2275_v1 }
0x10a7   :  { %2081 = vmatpush3.bf16.msra.mxu1 %v2398_v31  ;;  %2084 = vmatprep.mubr.msk.bf16.mxu1 %vm2276_vm0, %v2275_v1 }
0x10a8   :  { %2082 = vmatprep.subr.bf16.mxu1 %v2275_v1 }
0x10a9   :  { %2075 = vmatpush3.bf16.msra.mxu0 %v2355_v5 }
0x10aa   :  { %2088 = vmatprep.subr.bf16.mxu0 %v2275_v1 }
0x10ab   :  { %2083 = vmatpush3.bf16.msra.mxu1 %v2410_v33 }
0x10ac   :  { %2077 = vmatmul.mubr.msk.bf16.vlgmr.msra.gmra.mrb[40].mxu0 %vm104_vm1, %v1290_v21  ;;  %2096 = vmatprep.subr.bf16.mxu1 %v2275_v1 }
0x10ad   :  { %2089 = vmatpush3.bf16.msra.mxu0 %v2403_v32  ;;  %2092 = vmatprep.mubr.msk.bf16.mxu0 %vm2276_vm0, %v2275_v1 }
0x10ae   :  { %2090 = vmatprep.subr.bf16.mxu0 %v2275_v1 }
0x10b1   :  { %2091 = vmatpush3.bf16.msra.mxu0 %v2418_v34 }
0x10b2   :  { %2104 = vmatprep.subr.bf16.mxu0 %v2275_v1 }
0x1177   :  { %v1256_v2 = vpop.f32.mrb[36].mxu0 }
0x1178   :  { %v1328_v5 = vpop.f32.mrb[36].mxu1  ;;  %v2062_v31 = vpop.f32.mrb[37].mxu0 }
0x1179   :  { %v1329_v26 = vadd.f32 %v1328_v5, %v1256_v2  ;;  %v2070_v33 = vpop.f32.mrb[37].mxu1  ;;  %v1259_v20 = vpop.f32.mrb[38].mxu0 }
0x117a   :  { %v1331_v27 = vpop.f32.mrb[38].mxu1  ;;  %v2063_v28 = vpop.f32.mrb[39].mxu0 }
0x117b   :  { %v1334_v29 = vadd.f32 %v2463_v49, %v1329_v26  ;;  %v2071_v32 = vpop.f32.mrb[39].mxu1 }
0x117d   :  { %2227 = vtanh.f32 %v1334_v29  ;;  %v1825_v46 = vmul.f32 -1.442695, %v1334_v29 }
0x117f   :  { %v1401_v36 = vpop.f32.mrb[40].mxu0 }
0x1180   :  { %v1453_v37 = vadd.f32 %v1401_v36, %v176_v35  ;;  %v2078_v34 = vpop.f32.mrb[41].mxu0 }
0x1181   :  { %v1404_v38 = vpop.f32.mrb[42].mxu0 }
0x1182   :  { %2229 = vtanh.f32 %v1453_v37  ;;  %v2079_v43 = vpop.f32.mrb[43].mxu0  ;;  %v1828_v47 = vmul.f32 -1.442695, %v1453_v37 }
0x1183   :  { %2231 = vpow2.f32 %v1825_v46 }
0x1184   :  { %2233 = vpow2.f32 %v1828_v47 }
0x1187   :  { %v2228_v44 = vpop.eup %2227 }
0x1188   :  { %1344 = vrot.lane.b32.xlu0 %v2228_v44, %s2278_s26 }
0x118c   :  { %v2230_v45 = vpop.eup %2229 }
0x118d   :  { %1463 = vrot.lane.b32.xlu1 %v2230_v45, %s2278_s26  ;;  %v2232_v48 = vpop.eup %2231 }
0x118e   :  { %v1338_v50 = vadd.f32 1.0, %v2232_v48  ;;  %v2234_v51 = vpop.eup %2233 }
0x118f   :  { %v1457_v8 = vadd.f32 1.0, %v2234_v51 }
0x1190   :  { %2235 = vrcp.f32 %v1338_v50 }
0x1191   :  { %2237 = vrcp.f32 %v1457_v8 }
0x119a   :  { %v2236_v39 = vpop.eup %2235 }
0x119b   :  { %v2238_v54 = vpop.eup %2237  ;;  %v1342_v42 = vmul.f32 %v2236_v39, %v2647_v7 }
0x119c   :  { %v1461_v14 = vmul.f32 %v2238_v54, %v2649_v11  ;;  %v2267_v11 = vld [vmem:[%s2798_s3] sm:$0xff]  }
0x11fa   :  { %v1345_v52 = vpop.permute.xlu0 %1344 }
0x11fb   :  { %v1347_v53 = vmul.f32 %v2236_v39, %v1345_v52 }
0x11fd   :  { %1349 = vrot.lane.b32.xlu0 %v1347_v53, %s2278_s26 }
0x11ff   :  { %v1464_v55 = vpop.permute.xlu1 %1463 }
0x1200   :  { %v1466_v56 = vmul.f32 %v2238_v54, %v1464_v55 }
0x1202   :  { %1468 = vrot.lane.b32.xlu1 %v1466_v56, %s2278_s26 }
0x126f   :  { %v1350_v57 = vpop.permute.xlu0 %1349 }
0x1270   :  { %v2690_v58 = vadd.f32 %v1350_v57, %v1342_v42 }
0x1272   :  { %2239 = vtanh.f32 %v2690_v58 }
0x1274   :  { %v1469_v59 = vpop.permute.xlu1 %1468 }
0x1275   :  { %v2694_v60 = vadd.f32 %v1469_v59, %v1461_v14 }
0x1277   :  { %2241 = vtanh.f32 %v2694_v60 }
0x127c   :  { %v2240_v40 = vpop.eup %2239 }
0x127d   :  { %1355 = vrot.lane.b32.xlu0 %v2240_v40, %s2278_s26 }
0x1281   :  { %v2242_v61 = vpop.eup %2241 }
0x1282   :  { %1474 = vrot.lane.b32.xlu1 %v2242_v61, %s2278_s26 }
0x12ef   :  { %v1356_v62 = vpop.permute.xlu0 %1355 }
0x12f0   :  { %v2699_v63 = vmul.f32 %v2236_v39, %v1356_v62 }
0x12f2   :  { %v1359_v0 = vpack.c.bf16 %v2699_v63, %v2699_v63 }
0x12f4   :  { %1408 = vrot.lane.b32.xlu0 %v1359_v0, %s2279_s18  ;;  %v1475_v4 = vpop.permute.xlu1 %1474 }
0x12f5   :  { %v1477_v9 = vmul.f32 %v2238_v54, %v1475_v4 }
0x12f7   :  { %v1478_v6 = vpack.c.bf16 %v1477_v9, %v1477_v9 }
0x12f9   :  { %1480 = vrot.lane.b32.xlu1 %v1478_v6, %s2279_s18 }
0x1366   :  { %v1409_v7 = vpop.permute.xlu0 %1408 }
0x1367   :  { %2085 = vmatmul.mubr.msk.bf16.vlgmr.msra.gmra.mrb[40].mxu1 %vm104_vm1, %v1409_v7 }
0x1368   :  { %2097 = vmatpush3.bf16.msra.mxu1 %v2267_v11  ;;  %2100 = vmatprep.mubr.msk.bf16.mxu1 %vm2276_vm0, %v2275_v1 }
0x1369   :  { %2098 = vmatprep.subr.bf16.mxu1 %v2275_v1 }
0x136b   :  { %v1481_v12 = vpop.permute.xlu1 %1480 }
0x136c   :  { %2099 = vmatpush3.bf16.msra.mxu1 %v2268_v15  ;;  %2093 = vmatmul.mubr.msk.bf16.vlgmr.msra.gmra.mrb[44].mxu0 %vm104_vm1, %v1481_v12 }
0x136d   :  { %2112 = vmatprep.subr.bf16.mxu1 %v2275_v1  ;;  %2105 = vmatpush3.bf16.msra.mxu0 %v2269_v19 }
0x136e   :  { %2106 = vmatprep.subr.bf16.mxu0 %v2275_v1  ;;  %2108 = vmatprep.mubr.msk.bf16.mxu0 %vm2276_vm0, %v2275_v1 }
0x136f   :  { %2101 = vmatmul.mubr.msk.bf16.vlgmr.msra.gmra.mrb[44].mxu1 %vm104_vm1, %v1481_v12 }
0x1370   :  { %2113 = vmatpush3.bf16.msra.mxu1 %v2270_v10  ;;  %2116 = vmatprep.mubr.msk.bf16.mxu1 %vm2276_vm0, %v2275_v1 }
0x1371   :  { %2114 = vmatprep.subr.bf16.mxu1 %v2275_v1  ;;  %2107 = vmatpush3.bf16.msra.mxu0 %v2271_v13  ;;  %v2273_v1 = vld [vmem:[%s2800_s4] ss:$0 sm:$0xff] }
0x1372   :  { %v179_v33 = vadd.f32 %v2273_v1, %v2440_v41  ;;  %v2274_v13 = vld [vmem:[%s2803_s7] ss:$0 sm:$0xff] }
0x1374   :  { %2115 = vmatpush3.bf16.msra.mxu1 %v2272_v24 }
0x143a   :  { %v1447_v18 = vpop.f32.mrb[40].mxu1 }
0x143b   :  { %v2086_v17 = vpop.f32.mrb[41].mxu1 }
0x143c   :  { %v1450_v21 = vpop.f32.mrb[42].mxu1  ;;  %v51_v17 = vld [vmem:[%s2804_s1] sm:$0xff] }
0x143d   :  { %v2087_v2 = vpop.f32.mrb[43].mxu1  ;;  %v1779_v21 = vadd.s32 4294967295, %v51_v17 }
0x143f   :  { %v1519_v5 = vpop.f32.mrb[44].mxu0  ;;  %vm405_vm2 = vcmp.eq.s32.totalorder %v1779_v21, 0  ;;  %vm978_vm3 = vcmp.eq.s32.totalorder %v1779_v21, 3  ;;  %vm1360_vm4 = vcmp.eq.s32.totalorder %v1779_v21, 5  ;;  %vm1741_vm5 = vcmp.eq.s32.totalorder %v1779_v21, 7 }
0x1440   :  { %v1520_v31 = vadd.f32 %v1519_v5, %v1447_v18  ;;  %v2094_v26 = vpop.f32.mrb[45].mxu0  ;;  %v406_v5 = vsel %vm405_vm2, 1, %v2277_v3  ;;  %v1742_v1 = vsel %vm1741_vm5, 1, %v2277_v3  ;;  %vm596_vm6 = vcmp.eq.s32.totalorder %v1779_v21, 1 }
0x1441   :  { %v1522_v20 = vpop.f32.mrb[46].mxu0  ;;  %v1361_v26 = vsel %vm1360_vm4, 1, %v2277_v3  ;;  %vm787_vm7 = vcmp.eq.s32.totalorder %v1779_v21, 2  ;;  %vm1169_vm8 = vcmp.eq.s32.totalorder %v1779_v21, 4  ;;  %vm1551_vm9 = vcmp.eq.s32.totalorder %v1779_v21, 6 }
0x1442   :  { %v1525_v27 = vadd.f32 %v2463_v49, %v1520_v31  ;;  %v1592_v28 = vpop.f32.mrb[44].mxu1  ;;  %v2095_v29 = vpop.f32.mrb[47].mxu0  ;;  %v979_v31 = vsel %vm978_vm3, 1, %v2277_v3  ;;  %vm1773_vm3 = vcmask 7168  }
0x1443   :  { %v1644_v32 = vadd.f32 %v1592_v28, %v179_v33  ;;  %v2102_v35 = vpop.f32.mrb[45].mxu1 }
0x1444   :  { %2243 = vtanh.f32 %v1525_v27  ;;  %v1595_v36 = vpop.f32.mrb[46].mxu1  ;;  %v1830_v43 = vmul.f32 -1.442695, %v1525_v27  ;;  %v597_v35 = vsel %vm596_vm6, 1, %v2277_v3 }
0x1445   :  { %2245 = vtanh.f32 %v1644_v32  ;;  %v2103_v37 = vpop.f32.mrb[47].mxu1  ;;  %v1833_v44 = vmul.f32 -1.442695, %v1644_v32  ;;  %v1836_v36 = vld [vmem:[%s2805_s8] ss:$0 sm:$0xff] }
0x1446   :  { %2247 = vpow2.f32 %v1830_v43  ;;  %v788_v37 = vsel %vm787_vm7, 1, %v2277_v3 }
0x1447   :  { %2249 = vpow2.f32 %v1833_v44 }
0x144e   :  { %v2244_v34 = vpop.eup %2243 }
0x144f   :  { %v2246_v38 = vpop.eup %2245  ;;  %1535 = vrot.lane.b32.xlu0 %v2244_v34, %s2278_s26  ;;  %v1170_v34 = vsel %vm1169_vm8, 1, %v2277_v3 }
0x1450   :  { %1654 = vrot.lane.b32.xlu1 %v2246_v38, %s2278_s26  ;;  %v2248_v41 = vpop.eup %2247  ;;  %v1552_v38 = vsel %vm1551_vm9, 1, %v2277_v3 }
0x1451   :  { %v2250_v49 = vpop.eup %2249  ;;  %v1529_v45 = vadd.f32 1.0, %v2248_v41 }
0x1452   :  { %v1648_v46 = vadd.f32 1.0, %v2250_v49 }
0x1453   :  { %2251 = vrcp.f32 %v1529_v45 }
0x1454   :  { %2253 = vrcp.f32 %v1648_v46 }
0x145d   :  { %v2252_v47 = vpop.eup %2251 }
0x145e   :  { %v2254_v50 = vpop.eup %2253  ;;  %v1533_v52 = vmul.f32 %v2252_v47, %v2690_v58 }
0x145f   :  { %v1652_v53 = vmul.f32 %v2254_v50, %v2694_v60 }
0x14c1   :  { %v1536_v48 = vpop.permute.xlu0 %1535 }
0x14c2   :  { %v1655_v51 = vpop.permute.xlu1 %1654  ;;  %v1538_v8 = vmul.f32 %v2252_v47, %v1536_v48 }
0x14c3   :  { %v1657_v39 = vmul.f32 %v2254_v50, %v1655_v51 }
0x14c4   :  { %1540 = vrot.lane.b32.xlu0 %v1538_v8, %s2278_s26 }
0x14c5   :  { %1659 = vrot.lane.b32.xlu1 %v1657_v39, %s2278_s26 }
0x1536   :  { %v1541_v54 = vpop.permute.xlu0 %1540 }
0x1537   :  { %v1660_v55 = vpop.permute.xlu1 %1659  ;;  %v2747_v56 = vadd.f32 %v1541_v54, %v1533_v52  ;;  %v15_v52 = vstv %s2806_s9 }
0x1538   :  { %v1662_v42 = vadd.f32 %v1660_v55, %v1652_v53  ;;  %16 = vst [vmem:[#allocation2] sm:$0x1] %v15_v52 }
0x1539   :  { %2255 = vtanh.f32 %v2747_v56 }
0x153a   :  { %2257 = vtanh.f32 %v1662_v42 }
0x1543   :  { %v2256_v57 = vpop.eup %2255 }
0x1544   :  { %v2258_v14 = vpop.eup %2257  ;;  %1546 = vrot.lane.b32.xlu0 %v2256_v57, %s2278_s26 }
0x1545   :  { %1665 = vrot.lane.b32.xlu1 %v2258_v14, %s2278_s26 }
0x15b6   :  { %v1547_v59 = vpop.permute.xlu0 %1546 }
0x15b7   :  { %v1666_v40 = vpop.permute.xlu1 %1665  ;;  %v2752_v61 = vmul.f32 %v2252_v47, %v1547_v59 }
0x15b8   :  { %v1668_v58 = vmul.f32 %v2254_v50, %v1666_v40 }
0x15b9   :  { %v1550_v60 = vpack.c.bf16 %v2752_v61, %v2752_v61 }
0x15ba   :  { %v1669_v62 = vpack.c.bf16 %v1668_v58, %v1668_v58  ;;  %v1837_v58 = vld [vmem:[#allocation2] ss:$0 sm:$0xff] }
0x15bb   :  { %1599 = vrot.lane.b32.xlu0 %v1550_v60, %s2279_s18 }
0x15bc   :  { %1671 = vrot.lane.b32.xlu1 %v1669_v62, %s2279_s18 }
0x162d   :  { %v1600_v0 = vpop.permute.xlu0 %1599 }
0x162e   :  { %v1672_v4 = vpop.permute.xlu1 %1671  ;;  %2109 = vmatmul.mubr.msk.bf16.vlgmr.msra.gmra.mrb[48].mxu0 %vm104_vm1, %v1600_v0 }
0x162f   :  { %2117 = vmatmul.mubr.msk.bf16.vlgmr.msra.gmra.mrb[48].mxu1 %vm104_vm1, %v1672_v4 }
0x1701   :  { %v1638_v9 = vpop.f32.mrb[48].mxu0 }
0x1702   :  { %v1710_v6 = vpop.f32.mrb[48].mxu1  ;;  %v2110_v7 = vpop.f32.mrb[49].mxu0 }
0x1703   :  { %v1711_v11 = vadd.f32 %v1710_v6, %v1638_v9  ;;  %v2118_v12 = vpop.f32.mrb[49].mxu1  ;;  %v1641_v15 = vpop.f32.mrb[50].mxu0 }
0x1704   :  { %v1713_v19 = vpop.f32.mrb[50].mxu1  ;;  %v2111_v10 = vpop.f32.mrb[51].mxu0 }
0x1705   :  { %v1716_v24 = vadd.f32 %v2274_v13, %v1711_v11  ;;  %v2119_v18 = vpop.f32.mrb[51].mxu1 }
0x1707   :  { %2259 = vtanh.f32 %v1716_v24  ;;  %v1835_v33 = vmul.f32 -1.442695, %v1716_v24 }
0x1709   :  { %2261 = vpow2.f32 %v1835_v33 }
0x1711   :  { %v2260_v2 = vpop.eup %2259 }
0x1712   :  { %1726 = vrot.lane.b32.xlu0 %v2260_v2, %s2278_s26 }
0x1713   :  { %v2262_v20 = vpop.eup %2261 }
0x1714   :  { %v1720_v27 = vadd.f32 1.0, %v2262_v20 }
0x1716   :  { %408 = vperm.xlu0 %2125, %v406_v5   ;;  %2263 = vrcp.f32 %v1720_v27 }
0x171a   :  { %981 = vperm.xlu0 %2125, %v979_v31  }
0x171e   :  { %1363 = vperm.xlu0 %2125, %v1361_v26  }
0x1720   :  { %v2264_v28 = vpop.eup %2263 }
0x1721   :  { %v1724_v43 = vmul.f32 %v2264_v28, %v2747_v56 }
0x1722   :  { %1744 = vperm.xlu0 %2125, %v1742_v1  }
0x1726   :  { %1754 = vrot.lane.b32.xlu0 %v1836_v36, %s2279_s18 }
0x1784   :  { %v1727_v29 = vpop.permute.xlu0 %1726 }
0x1785   :  { %v1729_v32 = vmul.f32 %v2264_v28, %v1727_v29 }
0x1787   :  { %1731 = vrot.lane.b32.xlu1 %v1729_v32, %s2278_s26 }
0x178b   :  { %599 = vperm.xlu1 %2126, %v597_v35  }
0x178f   :  { %790 = vperm.xlu1 %2126, %v788_v37  }
0x1793   :  { %1172 = vperm.xlu1 %2126, %v1170_v34  }
0x1795   :  { %v409_v46 = vpop.permute.xlu0 %408 }
0x1796   :  { %vm410_vm10 = vcmp.eq.s32.totalorder %v409_v46, 1 }
0x1797   :  { %1554 = vperm.xlu1 %2126, %v1552_v38   ;;  %v411_v51 = vsel %vm410_vm10, %v2479_v30, 0.0 }
0x1799   :  { %v982_v48 = vpop.permute.xlu0 %981 }
0x179a   :  { %vm983_vm13 = vcmp.eq.s32.totalorder %v982_v48, 1 }
0x179d   :  { %v1364_v8 = vpop.permute.xlu0 %1363 }
0x179e   :  { %vm1365_vm15 = vcmp.eq.s32.totalorder %v1364_v8, 1 }
0x17a1   :  { %v1745_v55 = vpop.permute.xlu0 %1744 }
0x17a2   :  { %vm1746_vm2 = vcmp.eq.s32.totalorder %v1745_v55, 1 }
0x17f9   :  { %v1732_v44 = vpop.permute.xlu1 %1731 }
0x17fa   :  { %v1734_v41 = vadd.f32 %v1732_v44, %v1724_v43 }
0x17fc   :  { %2265 = vtanh.f32 %v1734_v41 }
0x1806   :  { %v2266_v49 = vpop.eup %2265 }
0x1807   :  { %1737 = vrot.lane.b32.xlu1 %v2266_v49, %s2278_s26 }
0x180a   :  { %v600_v45 = vpop.permute.xlu1 %599 }
0x180b   :  { %vm601_vm11 = vcmp.eq.s32.totalorder %v600_v45, 1 }
0x180c   :  { %v602_v3 = vsel %vm601_vm11, %v2523_v23, %v411_v51 }
0x180e   :  { %v791_v47 = vpop.permute.xlu1 %790 }
0x180f   :  { %vm792_vm12 = vcmp.eq.s32.totalorder %v791_v47, 1 }
0x1810   :  { %v793_v39 = vsel %vm792_vm12, %v2567_v25, %v602_v3  ;;  %v1755_v25 = vpop.permute.xlu0 %1754 }
0x1811   :  { %v984_v54 = vsel %vm983_vm13, %v2611_v16, %v793_v39 }
0x1812   :  { %v1173_v50 = vpop.permute.xlu1 %1172 }
0x1813   :  { %vm1174_vm14 = vcmp.eq.s32.totalorder %v1173_v50, 1 }
0x1814   :  { %v1175_v56 = vsel %vm1174_vm14, %v2655_v22, %v984_v54 }
0x1815   :  { %v1366_v23 = vsel %vm1365_vm15, %v2699_v63, %v1175_v56 }
0x1816   :  { %v1555_v53 = vpop.permute.xlu1 %1554 }
0x1817   :  { %vm1556_vm0 = vcmp.eq.s32.totalorder %v1555_v53, 1 }
0x1818   :  { %v1557_v57 = vsel %vm1556_vm0, %v2752_v61, %v1366_v23 }
0x1879   :  { %v1738_v30 = vpop.permute.xlu1 %1737 }
0x187a   :  { %v1740_v42 = vmul.f32 %v2264_v28, %v1738_v30 }
0x187c   :  { %v1747_v14 = vsel %vm1746_vm2, %v1740_v42, %v1557_v57 }
0x187d   :  { %v1757_v59 = vmul.f32 %v1755_v25, %v1747_v14 }
0x187f   :  { %1759 = vrot.lane.b32.xlu1 %v1757_v59, %s2279_s18 }
0x18f1   :  { %v1760_v40 = vpop.permute.xlu1 %1759 }
0x18f2   :  { %v1762_v16 = vsel %vm104_vm1, %v1760_v40, 0.0 }
0x18f3   :  { %1763 = vadd.xlane.f32.xlu0 %v1762_v16 }
0x1980   :  { %v1764_v22 = vpop.xlane.xlu0 %1763 }
0x1981   :  { %v1772_v60 = vadd.f32 %v1837_v58, %v1764_v22 }
0x1983   :  { %1774 = vst.msk [vmem:[%s2807_s10] sm:$0xff] %vm1773_vm3, %v1772_v60 }

</bundles_post_ra>
